<compile_context>
chip_gen: v7x
topology: tpu7x:2x2x1
jax: 0.10.0
libtpu: 0.0.40
codegen_flags: <defaults>
</compile_context>

<pallas_src>
import jax
import jax.numpy as jnp
from jax.experimental import pallas as pl
from jax.experimental.pallas import tpu as pltpu


def _round_up(v, m):
    return ((v + m - 1) // m) * m


def _cdiv(a, b):
    return -(-a // b)


def make_fused_mlp_kernel(num_layers, layer_dims):
    """Kernel computing num_layers x (Linear -> LayerNorm -> APELU).

    layer_dims: list of (n_true, n_pad) output widths per layer.
    """

    def kernel(*refs):
        x_ref = refs[0]
        layer_refs = refs[1:1 + 2 * num_layers]       # (W, packed[b;gamma;beta]) per layer
        apelu_ref = refs[1 + 2 * num_layers]          # SMEM (2,): [alpha, beta]
        o_ref = refs[2 + 2 * num_layers]

        alpha = apelu_ref[0]
        beta = apelu_ref[1]

        h = x_ref[...]                                # (tm, Kp0) bf16, zero-padded lanes

        for li in range(num_layers):                  # unrolled at trace time
            w_ref, p_ref = layer_refs[2 * li], layer_refs[2 * li + 1]
            n_true, n_pad = layer_dims[li]

            # Linear on the MXU: bf16 operands, f32 accumulation.  Padded rows
            # of W and padded bias columns are zero, so padded output columns
            # of y are exactly zero.
            y = jnp.dot(h, w_ref[...], preferred_element_type=jnp.float32)
            y = y + p_ref[0:1, :]                     # bias

            # LayerNorm over the TRUE feature width, two-pass statistics
            # (var = mean((y-m)^2)) to avoid E[y^2]-E[y]^2 cancellation.
            inv_n = 1.0 / float(n_true)
            m = jnp.sum(y, axis=-1, keepdims=True) * inv_n
            d = y - m
            if n_pad > n_true:
                # Mask padded lanes out of the centered sum (they hold -m).
                col = jax.lax.broadcasted_iota(jnp.int32, (1, n_pad), 1)
                d = d * (col < n_true).astype(jnp.float32)
            var = jnp.sum(d * d, axis=-1, keepdims=True) * inv_n
            # Padded gamma/beta are zero, so padded lanes come back to exactly 0.
            yn = d * jax.lax.rsqrt(var + 1e-5) * p_ref[1:2, :] + p_ref[2:3, :]

            # APELU + nan_to_num (torch semantics).  Dropout is identity (eval).
            act = jnp.where(yn >= 0, yn, alpha * yn * jnp.exp(beta * yn))
            act = jnp.nan_to_num(act)

            if li + 1 < num_layers:
                h = act.astype(jnp.bfloat16)          # bf16 inter-layer carry
            else:
                o_ref[...] = act.astype(o_ref.dtype)

    return kernel


def init_base_mlp_params(key, input_dim, hidden_dim, output_dim, num_layers):
    """Deterministic synthetic parameters matching BaseMLP's shapes (PyTorch layout)."""
    params = []
    prev = input_dim
    for i in range(num_layers):
        out = output_dim if i == num_layers - 1 else hidden_dim
        key, kw, kb = jax.random.split(key, 3)
        bound = 1.0 / jnp.sqrt(prev)
        w = jax.random.uniform(kw, (out, prev), jnp.float32, -bound, bound)  # (out, in)
        b = jax.random.uniform(kb, (out,), jnp.float32, -bound, bound)
        gamma = jnp.ones((out,), jnp.float32)     # LayerNorm weight
        beta_ln = jnp.zeros((out,), jnp.float32)  # LayerNorm bias
        params.append(dict(w=w, b=b, gamma=gamma, beta_ln=beta_ln))
        prev = out
    # Shared APELU parameters (single activation instance in BaseMLP)
    alpha = jnp.array([0.01], jnp.float32)
    beta_act = jnp.array([1.0], jnp.float32)
    return params, alpha, beta_act


def prepare_params(params, alpha, beta_act):
    """One-time prep: transpose, zero-pad feature dims to 128 lanes, cast W to
    bf16, and pack [bias; gamma; beta] into one (8, Np) f32 block per layer."""
    prepared = []
    dims = []  # (in_true, out_true, in_pad, out_pad)
    for p in params:
        out_dim, in_dim = p["w"].shape
        kp = _round_up(in_dim, 128)
        np_ = _round_up(out_dim, 128)
        w_t = jnp.zeros((kp, np_), jnp.float32).at[:in_dim, :out_dim].set(p["w"].T)
        w_t = w_t.astype(jnp.bfloat16)                       # bf16 MXU operand
        pkd = jnp.zeros((8, np_), jnp.float32)               # rows: bias, gamma, beta
        pkd = pkd.at[0, :out_dim].set(p["b"])
        pkd = pkd.at[1, :out_dim].set(p["gamma"])
        pkd = pkd.at[2, :out_dim].set(p["beta_ln"])
        prepared.append((w_t, pkd))
        dims.append((in_dim, out_dim, kp, np_))
    apelu = jnp.array([alpha[0], beta_act[0]], jnp.float32)  # (2,) -> SMEM
    return prepared, dims, apelu


def _base_mlp_forward_impl(x, prepared, dims, apelu, tm_max, min_tiles,
                           single_buffer_params):
    M, in_dim = x.shape
    num_layers = len(prepared)
    kp0 = dims[0][2]
    out_true = dims[-1][1]
    np_last = dims[-1][3]
    max_np = max(d[3] for d in dims)

    # Balanced batch tiling: at least `min_tiles` grid steps (v7x megacore),
    # tm a multiple of 16 sublanes (bf16 input), minimal padded rows.
    n_tiles = max(min_tiles, _cdiv(M, tm_max))
    tm = _round_up(_cdiv(M, n_tiles), 16)
    n_tiles = max(min_tiles, _cdiv(M, tm))
    m_pad = n_tiles * tm

    # bf16 activation input: halves the per-step x DMA bytes (matmul is bf16
    # anyway, so numerics are unchanged).
    xp = jnp.zeros((m_pad, kp0), jnp.bfloat16)
    xp = xp.at[:M, :in_dim].set(x.astype(jnp.bfloat16))

    def _const_spec(shape):
        if single_buffer_params:
            # Constant index_map -> no point double-buffering these blocks.
            return pl.BlockSpec(shape, lambda i: (0, 0),
                                pipeline_mode=pl.Buffered(1))
        return pl.BlockSpec(shape, lambda i: (0, 0))

    inputs = [xp]
    in_specs = [pl.BlockSpec((tm, kp0), lambda i: (i, 0))]
    for (w_t, pkd), (_, _, kp, np_) in zip(prepared, dims):
        inputs += [w_t, pkd]
        in_specs += [_const_spec((kp, np_)),     # weights: full, replicated
                     _const_spec((8, np_))]      # packed bias/gamma/beta
    inputs.append(apelu)
    in_specs.append(pl.BlockSpec(memory_space=pltpu.MemorySpace.SMEM))

    # VMEM budget: parameters (x buffer count) + double-buffered x/out tiles
    # + headroom for per-layer f32 intermediates.  Capped at 48 MiB, which is
    # safe on v7x's 64 MiB physical VMEM as well as v5e/v6e's 128 MiB.
    pbuf = 1 if single_buffer_params else 2
    param_bytes = sum(kp * np_ * 2 + 8 * np_ * 4 for (_, _, kp, np_) in dims)
    io_bytes = 2 * tm * kp0 * 2 + 2 * tm * np_last * 4
    scratch_bytes = 6 * tm * max_np * 4
    need = pbuf * param_bytes + io_bytes + scratch_bytes
    vmem_limit = min(48 * 1024 * 1024, max(16 * 1024 * 1024, int(2 * need)))

    kernel = make_fused_mlp_kernel(num_layers, [(d[1], d[3]) for d in dims])

    out = pl.pallas_call(
        kernel,
        out_shape=jax.ShapeDtypeStruct((m_pad, np_last), jnp.float32),
        grid=(m_pad // tm,),
        in_specs=in_specs,
        out_specs=pl.BlockSpec((tm, np_last), lambda i: (i, 0)),
        compiler_params=pltpu.CompilerParams(
            dimension_semantics=("parallel",),           # megacore split on v7x
            vmem_limit_bytes=vmem_limit,
        ),
    )(*inputs)
    out = jax.block_until_ready(out)
    return out[:M, :out_true]


def base_mlp_forward(x, prepared, dims, apelu, tm_max=512, min_tiles=2):
    """Full BaseMLP forward (plain-MLP path) as a single fused pallas_call."""
    try:
        return _base_mlp_forward_impl(x, prepared, dims, apelu, tm_max,
                                      min_tiles, single_buffer_params=True)
    except Exception:
        # Fallback if this jax build rejects pipeline_mode=pl.Buffered(1):
        # identical kernel with default (double-buffered) parameter blocks.
        return _base_mlp_forward_impl(x, prepared, dims, apelu, tm_max,
                                      min_tiles, single_buffer_params=False)


def base_mlp_reference(x, params, alpha, beta_act):
    """Pure-JAX reference.  Mirrors the kernel's deliberate precision choices
    (bf16 matmul operands / bf16 inter-layer carry, f32 accumulation and f32
    LayerNorm/APELU math); otherwise matches PyTorch semantics, including
    two-pass LayerNorm variance."""
    a = alpha[0]
    bact = beta_act[0]
    h = x.astype(jnp.bfloat16)
    n = len(params)
    for i, p in enumerate(params):
        y = jnp.dot(h, p["w"].T.astype(jnp.bfloat16),
                    preferred_element_type=jnp.float32) + p["b"]
        m = jnp.mean(y, axis=-1, keepdims=True)
        var = jnp.mean((y - m) * (y - m), axis=-1, keepdims=True)
        yn = (y - m) * jax.lax.rsqrt(var + 1e-5) * p["gamma"] + p["beta_ln"]
        act = jnp.where(yn >= 0, yn, a * yn * jnp.exp(bact * yn))
        act = jnp.nan_to_num(act)
        h = act.astype(jnp.bfloat16) if i + 1 < n else act
    return h


if __name__ == "__main__":
    key = jax.random.PRNGKey(0)
    batch, input_dim, hidden_dim, output_dim, num_layers = 8, 16, 32, 8, 3

    key, kx = jax.random.split(key)
    x = jax.random.normal(kx, (batch, input_dim), jnp.float32)

    params, alpha, beta_act = init_base_mlp_params(
        key, input_dim, hidden_dim, output_dim, num_layers)
    prepared, dims, apelu = prepare_params(params, alpha, beta_act)

    out = base_mlp_forward(x, prepared, dims, apelu)
    out = jax.block_until_ready(out)

    ref = base_mlp_reference(x, params, alpha, beta_act)
    assert out.shape == (batch, output_dim)
    assert bool(jnp.all(jnp.isfinite(out)))
    assert jnp.allclose(out, ref, atol=2e-2, rtol=2e-2), (
        "max abs diff = %f" % float(jnp.max(jnp.abs(out - ref))))

    print("KERNEL_OK")
</pallas_src>

<mosaic_0001>
module attributes {stable_mosaic.version = 11 : i64} {
  func.func @kernel(%arg0: i32, %arg1: memref<16x128xbf16, #tpu.memory_space<vmem>>, %arg2: memref<128x128xbf16, #tpu.memory_space<vmem>>, %arg3: memref<8x128xf32, #tpu.memory_space<vmem>>, %arg4: memref<128x128xbf16, #tpu.memory_space<vmem>>, %arg5: memref<8x128xf32, #tpu.memory_space<vmem>>, %arg6: memref<128x128xbf16, #tpu.memory_space<vmem>>, %arg7: memref<8x128xf32, #tpu.memory_space<vmem>>, %arg8: memref<2xf32, #tpu.memory_space<smem>>, %arg9: memref<16x128xf32, #tpu.memory_space<vmem>>) attributes {dimension_semantics = [#tpu.dimension_semantics<parallel>], iteration_bounds = array<i64: 2>, scalar_prefetch = 0 : i64, scratch_operands = 0 : i64, tpu.core_type = #tpu.core_type<tc>, window_params = [{transform_indices = @transform_0, window_bounds = array<i64: 16, 128>}, {pipeline_mode = #tpu.pipeline_mode<synchronous>, transform_indices = @transform_1, window_bounds = array<i64: 128, 128>}, {pipeline_mode = #tpu.pipeline_mode<synchronous>, transform_indices = @transform_2, window_bounds = array<i64: 8, 128>}, {pipeline_mode = #tpu.pipeline_mode<synchronous>, transform_indices = @transform_3, window_bounds = array<i64: 128, 128>}, {pipeline_mode = #tpu.pipeline_mode<synchronous>, transform_indices = @transform_4, window_bounds = array<i64: 8, 128>}, {pipeline_mode = #tpu.pipeline_mode<synchronous>, transform_indices = @transform_5, window_bounds = array<i64: 128, 128>}, {pipeline_mode = #tpu.pipeline_mode<synchronous>, transform_indices = @transform_6, window_bounds = array<i64: 8, 128>}, {transform_indices = @transform_7, window_bounds = array<i64: 2>}, {transform_indices = @transform_8, window_bounds = array<i64: 16, 128>}]} {
    %c0 = arith.constant 0 : index
    %0 = memref.load %arg8[%c0] : memref<2xf32, #tpu.memory_space<smem>>
    %c1 = arith.constant 1 : index
    %1 = memref.load %arg8[%c1] : memref<2xf32, #tpu.memory_space<smem>>
    %c0_0 = arith.constant 0 : index
    %c0_1 = arith.constant 0 : index
    %2 = vector.load %arg1[%c0_0, %c0_1] : memref<16x128xbf16, #tpu.memory_space<vmem>>, vector<16x128xbf16>
    %c0_2 = arith.constant 0 : index
    %c0_3 = arith.constant 0 : index
    %3 = vector.load %arg2[%c0_2, %c0_3] : memref<128x128xbf16, #tpu.memory_space<vmem>>, vector<128x128xbf16>
    %cst = arith.constant dense<0.000000e+00> : vector<16x128xf32>
    %4 = tpu.matmul %2, %3, %cst {dimension_numbers = #tpu.dot_dimension_numbers<[1], [0], [0], [1], [0, 0, 1, 1], [], []>} : vector<16x128xbf16>, vector<128x128xbf16>, vector<16x128xf32> -> vector<16x128xf32>
    %c0_4 = arith.constant 0 : index
    %c0_5 = arith.constant 0 : index
    %5 = vector.load %arg3[%c0_4, %c0_5] : memref<8x128xf32, #tpu.memory_space<vmem>>, vector<1x128xf32>
    %6 = vector.broadcast %5 : vector<1x128xf32> to vector<16x128xf32>
    %7 = arith.addf %4, %6 : vector<16x128xf32>
    %cst_6 = arith.constant dense<0.000000e+00> : vector<16xf32>
    %8 = vector.multi_reduction <add>, %7, %cst_6 [1] : vector<16x128xf32> to vector<16xf32>
    %9 = vector.shape_cast %8 : vector<16xf32> to vector<16x1xf32>
    %cst_7 = arith.constant 3.125000e-02 : f32
    %10 = vector.broadcast %cst_7 : f32 to vector<16x1xf32>
    %11 = arith.mulf %9, %10 : vector<16x1xf32>
    %12 = vector.broadcast %11 : vector<16x1xf32> to vector<16x128xf32>
    %13 = arith.subf %7, %12 : vector<16x128xf32>
    %14 = tpu.iota {dimensions = array<i32: 1>} : vector<1x128xi32>
    %c32_i32 = arith.constant 32 : i32
    %15 = vector.broadcast %c32_i32 : i32 to vector<1x128xi32>
    %16 = arith.cmpi slt, %14, %15 : vector<1x128xi32>
    %17 = arith.extui %16 : vector<1x128xi1> to vector<1x128xi32>
    %18 = arith.sitofp %17 : vector<1x128xi32> to vector<1x128xf32>
    %19 = vector.broadcast %18 : vector<1x128xf32> to vector<16x128xf32>
    %20 = arith.mulf %13, %19 : vector<16x128xf32>
    %21 = arith.mulf %20, %20 : vector<16x128xf32>
    %cst_8 = arith.constant dense<0.000000e+00> : vector<16xf32>
    %22 = vector.multi_reduction <add>, %21, %cst_8 [1] : vector<16x128xf32> to vector<16xf32>
    %23 = vector.shape_cast %22 : vector<16xf32> to vector<16x1xf32>
    %cst_9 = arith.constant 3.125000e-02 : f32
    %24 = vector.broadcast %cst_9 : f32 to vector<16x1xf32>
    %25 = arith.mulf %23, %24 : vector<16x1xf32>
    %cst_10 = arith.constant 9.99999974E-6 : f32
    %26 = vector.broadcast %cst_10 : f32 to vector<16x1xf32>
    %27 = arith.addf %25, %26 : vector<16x1xf32>
    %28 = math.rsqrt %27 : vector<16x1xf32>
    %29 = vector.broadcast %28 : vector<16x1xf32> to vector<16x128xf32>
    %30 = arith.mulf %20, %29 : vector<16x128xf32>
    %c1_11 = arith.constant 1 : index
    %c0_12 = arith.constant 0 : index
    %31 = vector.load %arg3[%c1_11, %c0_12] : memref<8x128xf32, #tpu.memory_space<vmem>>, vector<1x128xf32>
    %32 = vector.broadcast %31 : vector<1x128xf32> to vector<16x128xf32>
    %33 = arith.mulf %30, %32 : vector<16x128xf32>
    %c2 = arith.constant 2 : index
    %c0_13 = arith.constant 0 : index
    %34 = vector.load %arg3[%c2, %c0_13] : memref<8x128xf32, #tpu.memory_space<vmem>>, vector<1x128xf32>
    %35 = vector.broadcast %34 : vector<1x128xf32> to vector<16x128xf32>
    %36 = arith.addf %33, %35 : vector<16x128xf32>
    %cst_14 = arith.constant 0.000000e+00 : f32
    %37 = vector.broadcast %cst_14 : f32 to vector<16x128xf32>
    %38 = arith.cmpf oge, %36, %37 : vector<16x128xf32>
    %39 = vector.broadcast %0 : f32 to vector<16x128xf32>
    %40 = arith.mulf %39, %36 : vector<16x128xf32>
    %41 = vector.broadcast %1 : f32 to vector<16x128xf32>
    %42 = arith.mulf %41, %36 : vector<16x128xf32>
    %43 = math.exp %42 : vector<16x128xf32>
    %44 = arith.mulf %40, %43 : vector<16x128xf32>
    %45 = arith.select %38, %36, %44 : vector<16x128xi1>, vector<16x128xf32>
    %46 = arith.cmpf one, %45, %45 : vector<16x128xf32>
    %cst_15 = arith.constant 0.000000e+00 : f32
    %47 = vector.broadcast %cst_15 : f32 to vector<16x128xf32>
    %48 = arith.select %46, %47, %45 : vector<16x128xi1>, vector<16x128xf32>
    %cst_16 = arith.constant 0x7F800000 : f32
    %49 = vector.broadcast %cst_16 : f32 to vector<16x128xf32>
    %50 = arith.cmpf oeq, %48, %49 : vector<16x128xf32>
    %cst_17 = arith.constant 3.40282347E+38 : f32
    %51 = vector.broadcast %cst_17 : f32 to vector<16x128xf32>
    %52 = arith.select %50, %51, %48 : vector<16x128xi1>, vector<16x128xf32>
    %cst_18 = arith.constant 0xFF800000 : f32
    %53 = vector.broadcast %cst_18 : f32 to vector<16x128xf32>
    %54 = arith.cmpf oeq, %52, %53 : vector<16x128xf32>
    %cst_19 = arith.constant -3.40282347E+38 : f32
    %55 = vector.broadcast %cst_19 : f32 to vector<16x128xf32>
    %56 = arith.select %54, %55, %52 : vector<16x128xi1>, vector<16x128xf32>
    %57 = arith.truncf %56 : vector<16x128xf32> to vector<16x128xbf16>
    %c0_20 = arith.constant 0 : index
    %c0_21 = arith.constant 0 : index
    %58 = vector.load %arg4[%c0_20, %c0_21] : memref<128x128xbf16, #tpu.memory_space<vmem>>, vector<128x128xbf16>
    %cst_22 = arith.constant dense<0.000000e+00> : vector<16x128xf32>
    %59 = tpu.matmul %57, %58, %cst_22 {dimension_numbers = #tpu.dot_dimension_numbers<[1], [0], [0], [1], [0, 0, 1, 1], [], []>} : vector<16x128xbf16>, vector<128x128xbf16>, vector<16x128xf32> -> vector<16x128xf32>
    %c0_23 = arith.constant 0 : index
    %c0_24 = arith.constant 0 : index
    %60 = vector.load %arg5[%c0_23, %c0_24] : memref<8x128xf32, #tpu.memory_space<vmem>>, vector<1x128xf32>
    %61 = vector.broadcast %60 : vector<1x128xf32> to vector<16x128xf32>
    %62 = arith.addf %59, %61 : vector<16x128xf32>
    %cst_25 = arith.constant dense<0.000000e+00> : vector<16xf32>
    %63 = vector.multi_reduction <add>, %62, %cst_25 [1] : vector<16x128xf32> to vector<16xf32>
    %64 = vector.shape_cast %63 : vector<16xf32> to vector<16x1xf32>
    %cst_26 = arith.constant 3.125000e-02 : f32
    %65 = vector.broadcast %cst_26 : f32 to vector<16x1xf32>
    %66 = arith.mulf %64, %65 : vector<16x1xf32>
    %67 = vector.broadcast %66 : vector<16x1xf32> to vector<16x128xf32>
    %68 = arith.subf %62, %67 : vector<16x128xf32>
    %69 = tpu.iota {dimensions = array<i32: 1>} : vector<1x128xi32>
    %c32_i32_27 = arith.constant 32 : i32
    %70 = vector.broadcast %c32_i32_27 : i32 to vector<1x128xi32>
    %71 = arith.cmpi slt, %69, %70 : vector<1x128xi32>
    %72 = arith.extui %71 : vector<1x128xi1> to vector<1x128xi32>
    %73 = arith.sitofp %72 : vector<1x128xi32> to vector<1x128xf32>
    %74 = vector.broadcast %73 : vector<1x128xf32> to vector<16x128xf32>
    %75 = arith.mulf %68, %74 : vector<16x128xf32>
    %76 = arith.mulf %75, %75 : vector<16x128xf32>
    %cst_28 = arith.constant dense<0.000000e+00> : vector<16xf32>
    %77 = vector.multi_reduction <add>, %76, %cst_28 [1] : vector<16x128xf32> to vector<16xf32>
    %78 = vector.shape_cast %77 : vector<16xf32> to vector<16x1xf32>
    %cst_29 = arith.constant 3.125000e-02 : f32
    %79 = vector.broadcast %cst_29 : f32 to vector<16x1xf32>
    %80 = arith.mulf %78, %79 : vector<16x1xf32>
    %cst_30 = arith.constant 9.99999974E-6 : f32
    %81 = vector.broadcast %cst_30 : f32 to vector<16x1xf32>
    %82 = arith.addf %80, %81 : vector<16x1xf32>
    %83 = math.rsqrt %82 : vector<16x1xf32>
    %84 = vector.broadcast %83 : vector<16x1xf32> to vector<16x128xf32>
    %85 = arith.mulf %75, %84 : vector<16x128xf32>
    %c1_31 = arith.constant 1 : index
    %c0_32 = arith.constant 0 : index
    %86 = vector.load %arg5[%c1_31, %c0_32] : memref<8x128xf32, #tpu.memory_space<vmem>>, vector<1x128xf32>
    %87 = vector.broadcast %86 : vector<1x128xf32> to vector<16x128xf32>
    %88 = arith.mulf %85, %87 : vector<16x128xf32>
    %c2_33 = arith.constant 2 : index
    %c0_34 = arith.constant 0 : index
    %89 = vector.load %arg5[%c2_33, %c0_34] : memref<8x128xf32, #tpu.memory_space<vmem>>, vector<1x128xf32>
    %90 = vector.broadcast %89 : vector<1x128xf32> to vector<16x128xf32>
    %91 = arith.addf %88, %90 : vector<16x128xf32>
    %cst_35 = arith.constant 0.000000e+00 : f32
    %92 = vector.broadcast %cst_35 : f32 to vector<16x128xf32>
    %93 = arith.cmpf oge, %91, %92 : vector<16x128xf32>
    %94 = vector.broadcast %0 : f32 to vector<16x128xf32>
    %95 = arith.mulf %94, %91 : vector<16x128xf32>
    %96 = vector.broadcast %1 : f32 to vector<16x128xf32>
    %97 = arith.mulf %96, %91 : vector<16x128xf32>
    %98 = math.exp %97 : vector<16x128xf32>
    %99 = arith.mulf %95, %98 : vector<16x128xf32>
    %100 = arith.select %93, %91, %99 : vector<16x128xi1>, vector<16x128xf32>
    %101 = arith.cmpf one, %100, %100 : vector<16x128xf32>
    %cst_36 = arith.constant 0.000000e+00 : f32
    %102 = vector.broadcast %cst_36 : f32 to vector<16x128xf32>
    %103 = arith.select %101, %102, %100 : vector<16x128xi1>, vector<16x128xf32>
    %cst_37 = arith.constant 0x7F800000 : f32
    %104 = vector.broadcast %cst_37 : f32 to vector<16x128xf32>
    %105 = arith.cmpf oeq, %103, %104 : vector<16x128xf32>
    %cst_38 = arith.constant 3.40282347E+38 : f32
    %106 = vector.broadcast %cst_38 : f32 to vector<16x128xf32>
    %107 = arith.select %105, %106, %103 : vector<16x128xi1>, vector<16x128xf32>
    %cst_39 = arith.constant 0xFF800000 : f32
    %108 = vector.broadcast %cst_39 : f32 to vector<16x128xf32>
    %109 = arith.cmpf oeq, %107, %108 : vector<16x128xf32>
    %cst_40 = arith.constant -3.40282347E+38 : f32
    %110 = vector.broadcast %cst_40 : f32 to vector<16x128xf32>
    %111 = arith.select %109, %110, %107 : vector<16x128xi1>, vector<16x128xf32>
    %112 = arith.truncf %111 : vector<16x128xf32> to vector<16x128xbf16>
    %c0_41 = arith.constant 0 : index
    %c0_42 = arith.constant 0 : index
    %113 = vector.load %arg6[%c0_41, %c0_42] : memref<128x128xbf16, #tpu.memory_space<vmem>>, vector<128x128xbf16>
    %cst_43 = arith.constant dense<0.000000e+00> : vector<16x128xf32>
    %114 = tpu.matmul %112, %113, %cst_43 {dimension_numbers = #tpu.dot_dimension_numbers<[1], [0], [0], [1], [0, 0, 1, 1], [], []>} : vector<16x128xbf16>, vector<128x128xbf16>, vector<16x128xf32> -> vector<16x128xf32>
    %c0_44 = arith.constant 0 : index
    %c0_45 = arith.constant 0 : index
    %115 = vector.load %arg7[%c0_44, %c0_45] : memref<8x128xf32, #tpu.memory_space<vmem>>, vector<1x128xf32>
    %116 = vector.broadcast %115 : vector<1x128xf32> to vector<16x128xf32>
    %117 = arith.addf %114, %116 : vector<16x128xf32>
    %cst_46 = arith.constant dense<0.000000e+00> : vector<16xf32>
    %118 = vector.multi_reduction <add>, %117, %cst_46 [1] : vector<16x128xf32> to vector<16xf32>
    %119 = vector.shape_cast %118 : vector<16xf32> to vector<16x1xf32>
    %cst_47 = arith.constant 1.250000e-01 : f32
    %120 = vector.broadcast %cst_47 : f32 to vector<16x1xf32>
    %121 = arith.mulf %119, %120 : vector<16x1xf32>
    %122 = vector.broadcast %121 : vector<16x1xf32> to vector<16x128xf32>
    %123 = arith.subf %117, %122 : vector<16x128xf32>
    %124 = tpu.iota {dimensions = array<i32: 1>} : vector<1x128xi32>
    %c8_i32 = arith.constant 8 : i32
    %125 = vector.broadcast %c8_i32 : i32 to vector<1x128xi32>
    %126 = arith.cmpi slt, %124, %125 : vector<1x128xi32>
    %127 = arith.extui %126 : vector<1x128xi1> to vector<1x128xi32>
    %128 = arith.sitofp %127 : vector<1x128xi32> to vector<1x128xf32>
    %129 = vector.broadcast %128 : vector<1x128xf32> to vector<16x128xf32>
    %130 = arith.mulf %123, %129 : vector<16x128xf32>
    %131 = arith.mulf %130, %130 : vector<16x128xf32>
    %cst_48 = arith.constant dense<0.000000e+00> : vector<16xf32>
    %132 = vector.multi_reduction <add>, %131, %cst_48 [1] : vector<16x128xf32> to vector<16xf32>
    %133 = vector.shape_cast %132 : vector<16xf32> to vector<16x1xf32>
    %cst_49 = arith.constant 1.250000e-01 : f32
    %134 = vector.broadcast %cst_49 : f32 to vector<16x1xf32>
    %135 = arith.mulf %133, %134 : vector<16x1xf32>
    %cst_50 = arith.constant 9.99999974E-6 : f32
    %136 = vector.broadcast %cst_50 : f32 to vector<16x1xf32>
    %137 = arith.addf %135, %136 : vector<16x1xf32>
    %138 = math.rsqrt %137 : vector<16x1xf32>
    %139 = vector.broadcast %138 : vector<16x1xf32> to vector<16x128xf32>
    %140 = arith.mulf %130, %139 : vector<16x128xf32>
    %c1_51 = arith.constant 1 : index
    %c0_52 = arith.constant 0 : index
    %141 = vector.load %arg7[%c1_51, %c0_52] : memref<8x128xf32, #tpu.memory_space<vmem>>, vector<1x128xf32>
    %142 = vector.broadcast %141 : vector<1x128xf32> to vector<16x128xf32>
    %143 = arith.mulf %140, %142 : vector<16x128xf32>
    %c2_53 = arith.constant 2 : index
    %c0_54 = arith.constant 0 : index
    %144 = vector.load %arg7[%c2_53, %c0_54] : memref<8x128xf32, #tpu.memory_space<vmem>>, vector<1x128xf32>
    %145 = vector.broadcast %144 : vector<1x128xf32> to vector<16x128xf32>
    %146 = arith.addf %143, %145 : vector<16x128xf32>
    %cst_55 = arith.constant 0.000000e+00 : f32
    %147 = vector.broadcast %cst_55 : f32 to vector<16x128xf32>
    %148 = arith.cmpf oge, %146, %147 : vector<16x128xf32>
    %149 = vector.broadcast %0 : f32 to vector<16x128xf32>
    %150 = arith.mulf %149, %146 : vector<16x128xf32>
    %151 = vector.broadcast %1 : f32 to vector<16x128xf32>
    %152 = arith.mulf %151, %146 : vector<16x128xf32>
    %153 = math.exp %152 : vector<16x128xf32>
    %154 = arith.mulf %150, %153 : vector<16x128xf32>
    %155 = arith.select %148, %146, %154 : vector<16x128xi1>, vector<16x128xf32>
    %156 = arith.cmpf one, %155, %155 : vector<16x128xf32>
    %cst_56 = arith.constant 0.000000e+00 : f32
    %157 = vector.broadcast %cst_56 : f32 to vector<16x128xf32>
    %158 = arith.select %156, %157, %155 : vector<16x128xi1>, vector<16x128xf32>
    %cst_57 = arith.constant 0x7F800000 : f32
    %159 = vector.broadcast %cst_57 : f32 to vector<16x128xf32>
    %160 = arith.cmpf oeq, %158, %159 : vector<16x128xf32>
    %cst_58 = arith.constant 3.40282347E+38 : f32
    %161 = vector.broadcast %cst_58 : f32 to vector<16x128xf32>
    %162 = arith.select %160, %161, %158 : vector<16x128xi1>, vector<16x128xf32>
    %cst_59 = arith.constant 0xFF800000 : f32
    %163 = vector.broadcast %cst_59 : f32 to vector<16x128xf32>
    %164 = arith.cmpf oeq, %162, %163 : vector<16x128xf32>
    %cst_60 = arith.constant -3.40282347E+38 : f32
    %165 = vector.broadcast %cst_60 : f32 to vector<16x128xf32>
    %166 = arith.select %164, %165, %162 : vector<16x128xi1>, vector<16x128xf32>
    %c0_61 = arith.constant 0 : index
    %c0_62 = arith.constant 0 : index
    %167 = vector.load %arg9[%c0_61, %c0_62] : memref<16x128xf32, #tpu.memory_space<vmem>>, vector<16x128xf32>
    tpu.vector_store %arg9[%c0_61, %c0_62], %166 {strides = array<i32>} : memref<16x128xf32, #tpu.memory_space<vmem>>, vector<16x128xf32>,
    return
  }
  func.func @transform_0(%arg0: i32) -> (i32, i32) {
    %c0_i32 = arith.constant 0 : i32
    %c0_i32_0 = arith.constant 0 : i32
    return %arg0, %c0_i32 : i32, i32
  }
  func.func @transform_1(%arg0: i32) -> (i32, i32) {
    %c0_i32 = arith.constant 0 : i32
    %c0_i32_0 = arith.constant 0 : i32
    %c0_i32_1 = arith.constant 0 : i32
    return %c0_i32, %c0_i32_0 : i32, i32
  }
  func.func @transform_2(%arg0: i32) -> (i32, i32) {
    %c0_i32 = arith.constant 0 : i32
    %c0_i32_0 = arith.constant 0 : i32
    %c0_i32_1 = arith.constant 0 : i32
    return %c0_i32, %c0_i32_0 : i32, i32
  }
  func.func @transform_3(%arg0: i32) -> (i32, i32) {
    %c0_i32 = arith.constant 0 : i32
    %c0_i32_0 = arith.constant 0 : i32
    %c0_i32_1 = arith.constant 0 : i32
    return %c0_i32, %c0_i32_0 : i32, i32
  }
  func.func @transform_4(%arg0: i32) -> (i32, i32) {
    %c0_i32 = arith.constant 0 : i32
    %c0_i32_0 = arith.constant 0 : i32
    %c0_i32_1 = arith.constant 0 : i32
    return %c0_i32, %c0_i32_0 : i32, i32
  }
  func.func @transform_5(%arg0: i32) -> (i32, i32) {
    %c0_i32 = arith.constant 0 : i32
    %c0_i32_0 = arith.constant 0 : i32
    %c0_i32_1 = arith.constant 0 : i32
    return %c0_i32, %c0_i32_0 : i32, i32
  }
  func.func @transform_6(%arg0: i32) -> (i32, i32) {
    %c0_i32 = arith.constant 0 : i32
    %c0_i32_0 = arith.constant 0 : i32
    %c0_i32_1 = arith.constant 0 : i32
    return %c0_i32, %c0_i32_0 : i32, i32
  }
  func.func @transform_7(%arg0: i32) -> i32 {
    %c0_i32 = arith.constant 0 : i32
    %c0_i32_0 = arith.constant 0 : i32
    return %c0_i32 : i32
  }
  func.func @transform_8(%arg0: i32) -> (i32, i32) {
    %c0_i32 = arith.constant 0 : i32
    %c0_i32_0 = arith.constant 0 : i32
    return %arg0, %c0_i32 : i32, i32
  }
}

module attributes {stable_mosaic.version = 11 : i64} {
  func.func @kernel(%arg0: i32, %arg1: memref<16x128xbf16, #tpu.memory_space<vmem>>, %arg2: memref<128x128xbf16, #tpu.memory_space<vmem>>, %arg3: memref<8x128xf32, #tpu.memory_space<vmem>>, %arg4: memref<128x128xbf16, #tpu.memory_space<vmem>>, %arg5: memref<8x128xf32, #tpu.memory_space<vmem>>, %arg6: memref<128x128xbf16, #tpu.memory_space<vmem>>, %arg7: memref<8x128xf32, #tpu.memory_space<vmem>>, %arg8: memref<2xf32, #tpu.memory_space<smem>>, %arg9: memref<16x128xf32, #tpu.memory_space<vmem>>) attributes {dimension_semantics = [#tpu.dimension_semantics<parallel>], iteration_bounds = array<i64: 2>, scalar_prefetch = 0 : i64, scratch_operands = 0 : i64, tpu.core_type = #tpu.core_type<tc>, window_params = [{transform_indices = @transform_0, window_bounds = array<i64: 16, 128>}, {pipeline_mode = #tpu.pipeline_mode<synchronous>, transform_indices = @transform_1, window_bounds = array<i64: 128, 128>}, {pipeline_mode = #tpu.pipeline_mode<synchronous>, transform_indices = @transform_2, window_bounds = array<i64: 8, 128>}, {pipeline_mode = #tpu.pipeline_mode<synchronous>, transform_indices = @transform_3, window_bounds = array<i64: 128, 128>}, {pipeline_mode = #tpu.pipeline_mode<synchronous>, transform_indices = @transform_4, window_bounds = array<i64: 8, 128>}, {pipeline_mode = #tpu.pipeline_mode<synchronous>, transform_indices = @transform_5, window_bounds = array<i64: 128, 128>}, {pipeline_mode = #tpu.pipeline_mode<synchronous>, transform_indices = @transform_6, window_bounds = array<i64: 8, 128>}, {transform_indices = @transform_7, window_bounds = array<i64: 2>}, {transform_indices = @transform_8, window_bounds = array<i64: 16, 128>}]} {
    %c0 = arith.constant 0 : index
    %0 = memref.load %arg8[%c0] : memref<2xf32, #tpu.memory_space<smem>>
    %c1 = arith.constant 1 : index
    %1 = memref.load %arg8[%c1] : memref<2xf32, #tpu.memory_space<smem>>
    %c0_0 = arith.constant 0 : index
    %c0_1 = arith.constant 0 : index
    %2 = vector.load %arg1[%c0_0, %c0_1] : memref<16x128xbf16, #tpu.memory_space<vmem>>, vector<16x128xbf16>
    %c0_2 = arith.constant 0 : index
    %c0_3 = arith.constant 0 : index
    %3 = vector.load %arg2[%c0_2, %c0_3] : memref<128x128xbf16, #tpu.memory_space<vmem>>, vector<128x128xbf16>
    %cst = arith.constant dense<0.000000e+00> : vector<16x128xf32>
    %4 = tpu.matmul %2, %3, %cst {dimension_numbers = #tpu.dot_dimension_numbers<[1], [0], [0], [1], [0, 0, 1, 1], [], []>} : vector<16x128xbf16>, vector<128x128xbf16>, vector<16x128xf32> -> vector<16x128xf32>
    %c0_4 = arith.constant 0 : index
    %c0_5 = arith.constant 0 : index
    %5 = vector.load %arg3[%c0_4, %c0_5] : memref<8x128xf32, #tpu.memory_space<vmem>>, vector<1x128xf32>
    %6 = vector.broadcast %5 : vector<1x128xf32> to vector<16x128xf32>
    %7 = arith.addf %4, %6 : vector<16x128xf32>
    %cst_6 = arith.constant dense<0.000000e+00> : vector<16xf32>
    %8 = vector.multi_reduction <add>, %7, %cst_6 [1] : vector<16x128xf32> to vector<16xf32>
    %9 = vector.shape_cast %8 : vector<16xf32> to vector<16x1xf32>
    %cst_7 = arith.constant 3.125000e-02 : f32
    %10 = vector.broadcast %cst_7 : f32 to vector<16x1xf32>
    %11 = arith.mulf %9, %10 : vector<16x1xf32>
    %12 = vector.broadcast %11 : vector<16x1xf32> to vector<16x128xf32>
    %13 = arith.subf %7, %12 : vector<16x128xf32>
    %14 = tpu.iota {dimensions = array<i32: 1>} : vector<1x128xi32>
    %c32_i32 = arith.constant 32 : i32
    %15 = vector.broadcast %c32_i32 : i32 to vector<1x128xi32>
    %16 = arith.cmpi slt, %14, %15 : vector<1x128xi32>
    %17 = arith.extui %16 : vector<1x128xi1> to vector<1x128xi32>
    %18 = arith.sitofp %17 : vector<1x128xi32> to vector<1x128xf32>
    %19 = vector.broadcast %18 : vector<1x128xf32> to vector<16x128xf32>
    %20 = arith.mulf %13, %19 : vector<16x128xf32>
    %21 = arith.mulf %20, %20 : vector<16x128xf32>
    %cst_8 = arith.constant dense<0.000000e+00> : vector<16xf32>
    %22 = vector.multi_reduction <add>, %21, %cst_8 [1] : vector<16x128xf32> to vector<16xf32>
    %23 = vector.shape_cast %22 : vector<16xf32> to vector<16x1xf32>
    %cst_9 = arith.constant 3.125000e-02 : f32
    %24 = vector.broadcast %cst_9 : f32 to vector<16x1xf32>
    %25 = arith.mulf %23, %24 : vector<16x1xf32>
    %cst_10 = arith.constant 9.99999974E-6 : f32
    %26 = vector.broadcast %cst_10 : f32 to vector<16x1xf32>
    %27 = arith.addf %25, %26 : vector<16x1xf32>
    %28 = math.rsqrt %27 : vector<16x1xf32>
    %29 = vector.broadcast %28 : vector<16x1xf32> to vector<16x128xf32>
    %30 = arith.mulf %20, %29 : vector<16x128xf32>
    %c1_11 = arith.constant 1 : index
    %c0_12 = arith.constant 0 : index
    %31 = vector.load %arg3[%c1_11, %c0_12] : memref<8x128xf32, #tpu.memory_space<vmem>>, vector<1x128xf32>
    %32 = vector.broadcast %31 : vector<1x128xf32> to vector<16x128xf32>
    %33 = arith.mulf %30, %32 : vector<16x128xf32>
    %c2 = arith.constant 2 : index
    %c0_13 = arith.constant 0 : index
    %34 = vector.load %arg3[%c2, %c0_13] : memref<8x128xf32, #tpu.memory_space<vmem>>, vector<1x128xf32>
    %35 = vector.broadcast %34 : vector<1x128xf32> to vector<16x128xf32>
    %36 = arith.addf %33, %35 : vector<16x128xf32>
    %cst_14 = arith.constant 0.000000e+00 : f32
    %37 = vector.broadcast %cst_14 : f32 to vector<16x128xf32>
    %38 = arith.cmpf oge, %36, %37 : vector<16x128xf32>
    %39 = vector.broadcast %0 : f32 to vector<16x128xf32>
    %40 = arith.mulf %39, %36 : vector<16x128xf32>
    %41 = vector.broadcast %1 : f32 to vector<16x128xf32>
    %42 = arith.mulf %41, %36 : vector<16x128xf32>
    %43 = math.exp %42 : vector<16x128xf32>
    %44 = arith.mulf %40, %43 : vector<16x128xf32>
    %45 = arith.select %38, %36, %44 : vector<16x128xi1>, vector<16x128xf32>
    %46 = arith.cmpf one, %45, %45 : vector<16x128xf32>
    %cst_15 = arith.constant 0.000000e+00 : f32
    %47 = vector.broadcast %cst_15 : f32 to vector<16x128xf32>
    %48 = arith.select %46, %47, %45 : vector<16x128xi1>, vector<16x128xf32>
    %cst_16 = arith.constant 0x7F800000 : f32
    %49 = vector.broadcast %cst_16 : f32 to vector<16x128xf32>
    %50 = arith.cmpf oeq, %48, %49 : vector<16x128xf32>
    %cst_17 = arith.constant 3.40282347E+38 : f32
    %51 = vector.broadcast %cst_17 : f32 to vector<16x128xf32>
    %52 = arith.select %50, %51, %48 : vector<16x128xi1>, vector<16x128xf32>
    %cst_18 = arith.constant 0xFF800000 : f32
    %53 = vector.broadcast %cst_18 : f32 to vector<16x128xf32>
    %54 = arith.cmpf oeq, %52, %53 : vector<16x128xf32>
    %cst_19 = arith.constant -3.40282347E+38 : f32
    %55 = vector.broadcast %cst_19 : f32 to vector<16x128xf32>
    %56 = arith.select %54, %55, %52 : vector<16x128xi1>, vector<16x128xf32>
    %57 = arith.truncf %56 : vector<16x128xf32> to vector<16x128xbf16>
    %c0_20 = arith.constant 0 : index
    %c0_21 = arith.constant 0 : index
    %58 = vector.load %arg4[%c0_20, %c0_21] : memref<128x128xbf16, #tpu.memory_space<vmem>>, vector<128x128xbf16>
    %cst_22 = arith.constant dense<0.000000e+00> : vector<16x128xf32>
    %59 = tpu.matmul %57, %58, %cst_22 {dimension_numbers = #tpu.dot_dimension_numbers<[1], [0], [0], [1], [0, 0, 1, 1], [], []>} : vector<16x128xbf16>, vector<128x128xbf16>, vector<16x128xf32> -> vector<16x128xf32>
    %c0_23 = arith.constant 0 : index
    %c0_24 = arith.constant 0 : index
    %60 = vector.load %arg5[%c0_23, %c0_24] : memref<8x128xf32, #tpu.memory_space<vmem>>, vector<1x128xf32>
    %61 = vector.broadcast %60 : vector<1x128xf32> to vector<16x128xf32>
    %62 = arith.addf %59, %61 : vector<16x128xf32>
    %cst_25 = arith.constant dense<0.000000e+00> : vector<16xf32>
    %63 = vector.multi_reduction <add>, %62, %cst_25 [1] : vector<16x128xf32> to vector<16xf32>
    %64 = vector.shape_cast %63 : vector<16xf32> to vector<16x1xf32>
    %cst_26 = arith.constant 3.125000e-02 : f32
    %65 = vector.broadcast %cst_26 : f32 to vector<16x1xf32>
    %66 = arith.mulf %64, %65 : vector<16x1xf32>
    %67 = vector.broadcast %66 : vector<16x1xf32> to vector<16x128xf32>
    %68 = arith.subf %62, %67 : vector<16x128xf32>
    %69 = tpu.iota {dimensions = array<i32: 1>} : vector<1x128xi32>
    %c32_i32_27 = arith.constant 32 : i32
    %70 = vector.broadcast %c32_i32_27 : i32 to vector<1x128xi32>
    %71 = arith.cmpi slt, %69, %70 : vector<1x128xi32>
    %72 = arith.extui %71 : vector<1x128xi1> to vector<1x128xi32>
    %73 = arith.sitofp %72 : vector<1x128xi32> to vector<1x128xf32>
    %74 = vector.broadcast %73 : vector<1x128xf32> to vector<16x128xf32>
    %75 = arith.mulf %68, %74 : vector<16x128xf32>
    %76 = arith.mulf %75, %75 : vector<16x128xf32>
    %cst_28 = arith.constant dense<0.000000e+00> : vector<16xf32>
    %77 = vector.multi_reduction <add>, %76, %cst_28 [1] : vector<16x128xf32> to vector<16xf32>
    %78 = vector.shape_cast %77 : vector<16xf32> to vector<16x1xf32>
    %cst_29 = arith.constant 3.125000e-02 : f32
    %79 = vector.broadcast %cst_29 : f32 to vector<16x1xf32>
    %80 = arith.mulf %78, %79 : vector<16x1xf32>
    %cst_30 = arith.constant 9.99999974E-6 : f32
    %81 = vector.broadcast %cst_30 : f32 to vector<16x1xf32>
    %82 = arith.addf %80, %81 : vector<16x1xf32>
    %83 = math.rsqrt %82 : vector<16x1xf32>
    %84 = vector.broadcast %83 : vector<16x1xf32> to vector<16x128xf32>
    %85 = arith.mulf %75, %84 : vector<16x128xf32>
    %c1_31 = arith.constant 1 : index
    %c0_32 = arith.constant 0 : index
    %86 = vector.load %arg5[%c1_31, %c0_32] : memref<8x128xf32, #tpu.memory_space<vmem>>, vector<1x128xf32>
    %87 = vector.broadcast %86 : vector<1x128xf32> to vector<16x128xf32>
    %88 = arith.mulf %85, %87 : vector<16x128xf32>
    %c2_33 = arith.constant 2 : index
    %c0_34 = arith.constant 0 : index
    %89 = vector.load %arg5[%c2_33, %c0_34] : memref<8x128xf32, #tpu.memory_space<vmem>>, vector<1x128xf32>
    %90 = vector.broadcast %89 : vector<1x128xf32> to vector<16x128xf32>
    %91 = arith.addf %88, %90 : vector<16x128xf32>
    %cst_35 = arith.constant 0.000000e+00 : f32
    %92 = vector.broadcast %cst_35 : f32 to vector<16x128xf32>
    %93 = arith.cmpf oge, %91, %92 : vector<16x128xf32>
    %94 = vector.broadcast %0 : f32 to vector<16x128xf32>
    %95 = arith.mulf %94, %91 : vector<16x128xf32>
    %96 = vector.broadcast %1 : f32 to vector<16x128xf32>
    %97 = arith.mulf %96, %91 : vector<16x128xf32>
    %98 = math.exp %97 : vector<16x128xf32>
    %99 = arith.mulf %95, %98 : vector<16x128xf32>
    %100 = arith.select %93, %91, %99 : vector<16x128xi1>, vector<16x128xf32>
    %101 = arith.cmpf one, %100, %100 : vector<16x128xf32>
    %cst_36 = arith.constant 0.000000e+00 : f32
    %102 = vector.broadcast %cst_36 : f32 to vector<16x128xf32>
    %103 = arith.select %101, %102, %100 : vector<16x128xi1>, vector<16x128xf32>
    %cst_37 = arith.constant 0x7F800000 : f32
    %104 = vector.broadcast %cst_37 : f32 to vector<16x128xf32>
    %105 = arith.cmpf oeq, %103, %104 : vector<16x128xf32>
    %cst_38 = arith.constant 3.40282347E+38 : f32
    %106 = vector.broadcast %cst_38 : f32 to vector<16x128xf32>
    %107 = arith.select %105, %106, %103 : vector<16x128xi1>, vector<16x128xf32>
    %cst_39 = arith.constant 0xFF800000 : f32
    %108 = vector.broadcast %cst_39 : f32 to vector<16x128xf32>
    %109 = arith.cmpf oeq, %107, %108 : vector<16x128xf32>
    %cst_40 = arith.constant -3.40282347E+38 : f32
    %110 = vector.broadcast %cst_40 : f32 to vector<16x128xf32>
    %111 = arith.select %109, %110, %107 : vector<16x128xi1>, vector<16x128xf32>
    %112 = arith.truncf %111 : vector<16x128xf32> to vector<16x128xbf16>
    %c0_41 = arith.constant 0 : index
    %c0_42 = arith.constant 0 : index
    %113 = vector.load %arg6[%c0_41, %c0_42] : memref<128x128xbf16, #tpu.memory_space<vmem>>, vector<128x128xbf16>
    %cst_43 = arith.constant dense<0.000000e+00> : vector<16x128xf32>
    %114 = tpu.matmul %112, %113, %cst_43 {dimension_numbers = #tpu.dot_dimension_numbers<[1], [0], [0], [1], [0, 0, 1, 1], [], []>} : vector<16x128xbf16>, vector<128x128xbf16>, vector<16x128xf32> -> vector<16x128xf32>
    %c0_44 = arith.constant 0 : index
    %c0_45 = arith.constant 0 : index
    %115 = vector.load %arg7[%c0_44, %c0_45] : memref<8x128xf32, #tpu.memory_space<vmem>>, vector<1x128xf32>
    %116 = vector.broadcast %115 : vector<1x128xf32> to vector<16x128xf32>
    %117 = arith.addf %114, %116 : vector<16x128xf32>
    %cst_46 = arith.constant dense<0.000000e+00> : vector<16xf32>
    %118 = vector.multi_reduction <add>, %117, %cst_46 [1] : vector<16x128xf32> to vector<16xf32>
    %119 = vector.shape_cast %118 : vector<16xf32> to vector<16x1xf32>
    %cst_47 = arith.constant 1.250000e-01 : f32
    %120 = vector.broadcast %cst_47 : f32 to vector<16x1xf32>
    %121 = arith.mulf %119, %120 : vector<16x1xf32>
    %122 = vector.broadcast %121 : vector<16x1xf32> to vector<16x128xf32>
    %123 = arith.subf %117, %122 : vector<16x128xf32>
    %124 = tpu.iota {dimensions = array<i32: 1>} : vector<1x128xi32>
    %c8_i32 = arith.constant 8 : i32
    %125 = vector.broadcast %c8_i32 : i32 to vector<1x128xi32>
    %126 = arith.cmpi slt, %124, %125 : vector<1x128xi32>
    %127 = arith.extui %126 : vector<1x128xi1> to vector<1x128xi32>
    %128 = arith.sitofp %127 : vector<1x128xi32> to vector<1x128xf32>
    %129 = vector.broadcast %128 : vector<1x128xf32> to vector<16x128xf32>
    %130 = arith.mulf %123, %129 : vector<16x128xf32>
    %131 = arith.mulf %130, %130 : vector<16x128xf32>
    %cst_48 = arith.constant dense<0.000000e+00> : vector<16xf32>
    %132 = vector.multi_reduction <add>, %131, %cst_48 [1] : vector<16x128xf32> to vector<16xf32>
    %133 = vector.shape_cast %132 : vector<16xf32> to vector<16x1xf32>
    %cst_49 = arith.constant 1.250000e-01 : f32
    %134 = vector.broadcast %cst_49 : f32 to vector<16x1xf32>
    %135 = arith.mulf %133, %134 : vector<16x1xf32>
    %cst_50 = arith.constant 9.99999974E-6 : f32
    %136 = vector.broadcast %cst_50 : f32 to vector<16x1xf32>
    %137 = arith.addf %135, %136 : vector<16x1xf32>
    %138 = math.rsqrt %137 : vector<16x1xf32>
    %139 = vector.broadcast %138 : vector<16x1xf32> to vector<16x128xf32>
    %140 = arith.mulf %130, %139 : vector<16x128xf32>
    %c1_51 = arith.constant 1 : index
    %c0_52 = arith.constant 0 : index
    %141 = vector.load %arg7[%c1_51, %c0_52] : memref<8x128xf32, #tpu.memory_space<vmem>>, vector<1x128xf32>
    %142 = vector.broadcast %141 : vector<1x128xf32> to vector<16x128xf32>
    %143 = arith.mulf %140, %142 : vector<16x128xf32>
    %c2_53 = arith.constant 2 : index
    %c0_54 = arith.constant 0 : index
    %144 = vector.load %arg7[%c2_53, %c0_54] : memref<8x128xf32, #tpu.memory_space<vmem>>, vector<1x128xf32>
    %145 = vector.broadcast %144 : vector<1x128xf32> to vector<16x128xf32>
    %146 = arith.addf %143, %145 : vector<16x128xf32>
    %cst_55 = arith.constant 0.000000e+00 : f32
    %147 = vector.broadcast %cst_55 : f32 to vector<16x128xf32>
    %148 = arith.cmpf oge, %146, %147 : vector<16x128xf32>
    %149 = vector.broadcast %0 : f32 to vector<16x128xf32>
    %150 = arith.mulf %149, %146 : vector<16x128xf32>
    %151 = vector.broadcast %1 : f32 to vector<16x128xf32>
    %152 = arith.mulf %151, %146 : vector<16x128xf32>
    %153 = math.exp %152 : vector<16x128xf32>
    %154 = arith.mulf %150, %153 : vector<16x128xf32>
    %155 = arith.select %148, %146, %154 : vector<16x128xi1>, vector<16x128xf32>
    %156 = arith.cmpf one, %155, %155 : vector<16x128xf32>
    %cst_56 = arith.constant 0.000000e+00 : f32
    %157 = vector.broadcast %cst_56 : f32 to vector<16x128xf32>
    %158 = arith.select %156, %157, %155 : vector<16x128xi1>, vector<16x128xf32>
    %cst_57 = arith.constant 0x7F800000 : f32
    %159 = vector.broadcast %cst_57 : f32 to vector<16x128xf32>
    %160 = arith.cmpf oeq, %158, %159 : vector<16x128xf32>
    %cst_58 = arith.constant 3.40282347E+38 : f32
    %161 = vector.broadcast %cst_58 : f32 to vector<16x128xf32>
    %162 = arith.select %160, %161, %158 : vector<16x128xi1>, vector<16x128xf32>
    %cst_59 = arith.constant 0xFF800000 : f32
    %163 = vector.broadcast %cst_59 : f32 to vector<16x128xf32>
    %164 = arith.cmpf oeq, %162, %163 : vector<16x128xf32>
    %cst_60 = arith.constant -3.40282347E+38 : f32
    %165 = vector.broadcast %cst_60 : f32 to vector<16x128xf32>
    %166 = arith.select %164, %165, %162 : vector<16x128xi1>, vector<16x128xf32>
    %c0_61 = arith.constant 0 : index
    %c0_62 = arith.constant 0 : index
    %167 = vector.load %arg9[%c0_61, %c0_62] : memref<16x128xf32, #tpu.memory_space<vmem>>, vector<16x128xf32>
    tpu.vector_store %arg9[%c0_61, %c0_62], %166 {strides = array<i32>} : memref<16x128xf32, #tpu.memory_space<vmem>>, vector<16x128xf32>,
    return
  }
  func.func @transform_0(%arg0: i32) -> (i32, i32) {
    %c0_i32 = arith.constant 0 : i32
    %c0_i32_0 = arith.constant 0 : i32
    return %arg0, %c0_i32 : i32, i32
  }
  func.func @transform_1(%arg0: i32) -> (i32, i32) {
    %c0_i32 = arith.constant 0 : i32
    %c0_i32_0 = arith.constant 0 : i32
    %c0_i32_1 = arith.constant 0 : i32
    return %c0_i32, %c0_i32_0 : i32, i32
  }
  func.func @transform_2(%arg0: i32) -> (i32, i32) {
    %c0_i32 = arith.constant 0 : i32
    %c0_i32_0 = arith.constant 0 : i32
    %c0_i32_1 = arith.constant 0 : i32
    return %c0_i32, %c0_i32_0 : i32, i32
  }
  func.func @transform_3(%arg0: i32) -> (i32, i32) {
    %c0_i32 = arith.constant 0 : i32
    %c0_i32_0 = arith.constant 0 : i32
    %c0_i32_1 = arith.constant 0 : i32
    return %c0_i32, %c0_i32_0 : i32, i32
  }
  func.func @transform_4(%arg0: i32) -> (i32, i32) {
    %c0_i32 = arith.constant 0 : i32
    %c0_i32_0 = arith.constant 0 : i32
    %c0_i32_1 = arith.constant 0 : i32
    return %c0_i32, %c0_i32_0 : i32, i32
  }
  func.func @transform_5(%arg0: i32) -> (i32, i32) {
    %c0_i32 = arith.constant 0 : i32
    %c0_i32_0 = arith.constant 0 : i32
    %c0_i32_1 = arith.constant 0 : i32
    return %c0_i32, %c0_i32_0 : i32, i32
  }
  func.func @transform_6(%arg0: i32) -> (i32, i32) {
    %c0_i32 = arith.constant 0 : i32
    %c0_i32_0 = arith.constant 0 : i32
    %c0_i32_1 = arith.constant 0 : i32
    return %c0_i32, %c0_i32_0 : i32, i32
  }
  func.func @transform_7(%arg0: i32) -> i32 {
    %c0_i32 = arith.constant 0 : i32
    %c0_i32_0 = arith.constant 0 : i32
    return %c0_i32 : i32
  }
  func.func @transform_8(%arg0: i32) -> (i32, i32) {
    %c0_i32 = arith.constant 0 : i32
    %c0_i32_0 = arith.constant 0 : i32
    return %arg0, %c0_i32 : i32, i32
  }
}

</mosaic_0001>

<bundles_post_ra>
// kernel: tpu_custom_call.1
= control target key start
LH: loop header
LB: loop body
LE: loop exit
PB: predicated region body
PF: predicated region fallthrough
CT: control target
= control target key end

     0   :  { %s2059_s0 = inlined_call_operand.hbm [shape: bf16[32,128], index: 0, kind: input, shape index: {}]   ;;  %s2060_s1 = inlined_call_operand.hbm [shape: bf16[128,128], index: 1, kind: input, shape index: {}]   ;;  %s2061_s2 = inlined_call_operand.hbm [shape: f32[8,128], index: 2, kind: input, shape index: {}]   ;;  %s2062_s3 = inlined_call_operand.hbm [shape: bf16[128,128], index: 3, kind: input, shape index: {}]   ;;  %s2063_s4 = inlined_call_operand.vmem [shape: f32[8,128], index: 4, kind: input, shape index: {}]   ;;  %s2064_s5 = inlined_call_operand.hbm [shape: bf16[128,128], index: 5, kind: input, shape index: {}]   ;;  %s2065_s6 = inlined_call_operand.vmem [shape: f32[8,128], index: 6, kind: input, shape index: {}]   ;;  %s2066_s7 = inlined_call_operand.vmem [shape: f32[2], index: 7, kind: input, shape index: {}]   ;;  %s2067_s8 = inlined_call_operand.hbm [shape: f32[32,128], index: 8, kind: output, shape index: {}]  }
   0x1   :  { %2074 = sst [smem:[#allocation19_spill]] %s2060_s1 }
   0x2   :  { %13 = vsyncpa [#allocation3], 0 }
   0x3   :  { %15 = vsyncpa [#allocation3 + $0x1], 0 }
   0x4   :  { %16 = vsyncpa [#allocation7], 0 }
   0x5   :  { %17 = vsyncpa [#allocation10], 0 }
   0x6   :  { %18 = vsyncpa [#allocation5], 0 }
   0x7   :  { %19 = vsyncpa [#allocation4], 0 }
   0x8   :  { %21 = vsyncpa [#allocation4 + $0x1], 0  ;;  %s1677_s27 = smov 0   ;;  %s1679_s28 = smov 0  }
   0x9   :  { %s1681_s29 = smov 0   ;;  %s1683_s30 = smov 0  }
   0xa LB: > { %s1619_s9 = smov [#allocation6]   ;;  %s1698_s11 = sadd.s32 4294967295, %s1617_s30   ;;  %s1617_s30 = sphi %s1683_s30, %s2099_s30   ;;  %s1613_s29 = sphi %s1681_s29, %s2098_s29   ;;  %s1609_s28 = sphi %s1679_s28, %s2097_s28   ;;  %s1605_s27 = sphi %s1677_s27, %s2096_s27  }
   0xb   : > { %s243_s10 = sshll.u32 %s1619_s9, 4  ;;  %p1081_p0 = scmp.ge.s32.totalorder %s1617_s30, 1  ;;  %s1703_s10 = int_to_ptr.vmem [resolvable:$true] %s243_s10 }
   0xc   : > { %p2070_p1 = scmp.eq.s32.totalorder %s1698_s11, 0  ;;  %p231_p2 = scmp.lt.s32.totalorder %s1617_s30, 3 }
   0xd   : > { %s1620_s13 = smov [#allocation9]   ;;  %s1621_s16 = smov [#allocation8]  }
   0xe   : > { %p1705_p3 = pnand %p1081_p0, %p231_p2  ;;  %s267_s14 = sshll.u32 %s1620_s13, 4  ;;  %s1718_s14 = int_to_ptr.vmem [resolvable:$true] %s267_s14 }
   0xf   : > { %s257_s17 = sshll.u32 %s1621_s16, 4  ;;  %s2077_s1 = sld [smem:[#allocation19_spill]]  ;;  %s1720_s17 = int_to_ptr.vmem [resolvable:$true] %s257_s17 }
  0x10   : > { %s2075_s12 = scalar_select %p1705_p3, 1, 0 }
  0x11   : > { %p1254_p5 = pneg %p1705_p3 }
  0x13   : > { %p1714_p6 = pnand %p1254_p5, %p2070_p1 }
  0x15   : > { %s1382_s20 = scalar_lea.hbm %s2077_s1, 1024  ;;  %p1730_p8 = pneg %p1714_p6 }
  0x16   : > { %p1383_p7 = scmp.ne.s32.totalorder %s2077_s1, %s1382_s20  ;;  %p1389_p11 = scmp.lt.u32.totalorder %s1382_s20, %s2077_s1 }
  0x18   : > { %p1385_p9 = pnand %p1730_p8, %p1383_p7 }
  0x1a   : > { %p1386_p10 = pneg %p1385_p9 }
  0x1c   : > { %p1391_p12 = pnand %p1389_p11, %p1386_p10 }
  0x1e   : > { %1394 = shalt.err (!%p1391_p12)
}
  0x1f   : > { %s1395_s26 = scalar_lea.vmem %s1703_s10, 1024  ;;  %p1403_p5 = scmp.lt.s32.totalorder %s1703_s10, %s1703_s10 }
  0x20   : > { %p1396_p13 = scmp.ne.s32.totalorder %s1703_s10, %s1395_s26  ;;  %p1404_p4 = scmp.lt.s32.totalorder %s1395_s26, %s1395_s26 }
  0x22   : > { %p1398_p0 = pnand %p1396_p13, %p1730_p8  ;;  %p1405_p7 = por %p1404_p4, %p1403_p5 }
  0x24   : > { %p1399_p2 = pneg %p1398_p0 }
  0x26   : > { %p1406_p9 = pnand %p1405_p7, %p1399_p2 }
  0x28   : > { %1409 = shalt.err (!%p1406_p9)
}
  0x29   : > { %s2068_s9 = smov 64   ;;  %s2072_s13 = smov 4  }
  0x2a   : > { %1257 = dma.hbm_to_vmem [thread:$0]  (!%p1714_p6), %s2077_s1, 1024, %s1703_s10, [#allocation7], %s2068_s9, %s2068_s9, %s2072_s13  }
  0x2b   : > { %s1410_s21 = scalar_lea.hbm %s2062_s3, 1024 }
  0x2c   : > { %p1411_p4 = scmp.ne.s32.totalorder %s2062_s3, %s1410_s21  ;;  %p1417_p12 = scmp.lt.u32.totalorder %s1410_s21, %s2062_s3 }
  0x2e   : > { %p1413_p10 = pnand %p1411_p4, %p1730_p8 }
  0x30   : > { %p1414_p11 = pneg %p1413_p10 }
  0x32   : > { %p1419_p13 = pnand %p1417_p12, %p1414_p11 }
  0x34   : > { %1422 = shalt.err (!%p1419_p13)
}
  0x35   : > { %s1423_s10 = scalar_lea.vmem %s1718_s14, 1024  ;;  %p1431_p7 = scmp.lt.s32.totalorder %s1718_s14, %s1718_s14 }
  0x36   : > { %p1424_p0 = scmp.ne.s32.totalorder %s1718_s14, %s1423_s10  ;;  %p1432_p9 = scmp.lt.s32.totalorder %s1423_s10, %s1423_s10 }
  0x38   : > { %p1426_p2 = pnand %p1424_p0, %p1730_p8  ;;  %p1433_p4 = por %p1432_p9, %p1431_p7 }
  0x3a   : > { %p1427_p5 = pneg %p1426_p2 }
  0x3c   : > { %p1434_p10 = pnand %p1433_p4, %p1427_p5 }
  0x3e   : > { %1437 = shalt.err (!%p1434_p10)
}
  0x3f   : > { %1263 = dma.hbm_to_vmem [thread:$0]  (!%p1714_p6), %s2062_s3, 1024, %s1718_s14, [#allocation10], %s2068_s9, %s2068_s9, %s2072_s13  }
  0x40   : > { %s1438_s21 = scalar_lea.hbm %s2061_s2, 128 }
  0x41   : > { %p1439_p11 = scmp.ne.s32.totalorder %s2061_s2, %s1438_s21  ;;  %p1445_p0 = scmp.lt.u32.totalorder %s1438_s21, %s2061_s2 }
  0x43   : > { %p1441_p12 = pnand %p1439_p11, %p1730_p8 }
  0x45   : > { %p1442_p13 = pneg %p1441_p12 }
  0x47   : > { %p1447_p2 = pnand %p1445_p0, %p1442_p13 }
  0x49   : > { %1450 = shalt.err (!%p1447_p2)
}
  0x4a   : > { %s1451_s14 = scalar_lea.vmem %s1720_s17, 128  ;;  %p1459_p4 = scmp.lt.s32.totalorder %s1720_s17, %s1720_s17 }
  0x4b   : > { %p1452_p5 = scmp.ne.s32.totalorder %s1720_s17, %s1451_s14  ;;  %p1460_p10 = scmp.lt.s32.totalorder %s1451_s14, %s1451_s14 }
  0x4d   : > { %p1454_p7 = pnand %p1452_p5, %p1730_p8  ;;  %p1461_p11 = por %p1460_p10, %p1459_p4 }
  0x4f   : > { %p1455_p9 = pneg %p1454_p7 }
  0x51   : > { %p1462_p12 = pnand %p1461_p11, %p1455_p9 }
  0x53   : > { %1465 = shalt.err (!%p1462_p12)
}
  0x54   : > { %1260 = dma.hbm_to_vmem [thread:$0]  (!%p1714_p6), %s2061_s2, 128, %s1720_s17, [#allocation7]  }
  0x55   : > { %s1624_s18 = smov [#allocation11]   ;;  %s300_s22 = sshll.u32 %s2066_s7, 4  ;;  %s301_s22 = int_to_ptr.vmem [resolvable:$true] %s300_s22 }
  0x56   : > { %s283_s19 = sshll.u32 %s1624_s18, 4  ;;  %s1466_s26 = scalar_lea.hbm %s2064_s5, 1024  ;;  %s284_s19 = int_to_ptr.vmem [resolvable:$true] %s283_s19 }
  0x57   : > { %p1467_p13 = scmp.ne.s32.totalorder %s2064_s5, %s1466_s26  ;;  %p1473_p5 = scmp.lt.u32.totalorder %s1466_s26, %s2064_s5 }
  0x59   : > { %p1469_p0 = pnand %p1467_p13, %p1730_p8 }
  0x5b   : > { %p1470_p2 = pneg %p1469_p0 }
  0x5d   : > { %p1475_p7 = pnand %p1473_p5, %p1470_p2 }
  0x5f   : > { %1478 = shalt.err (!%p1475_p7)
}
  0x60   : > { %s1479_s16 = scalar_lea.vmem %s284_s19, 1024  ;;  %p1487_p11 = scmp.lt.s32.totalorder %s284_s19, %s284_s19 }
  0x61   : > { %p1480_p9 = scmp.ne.s32.totalorder %s284_s19, %s1479_s16  ;;  %p1488_p12 = scmp.lt.s32.totalorder %s1479_s16, %s1479_s16 }
  0x63   : > { %p1482_p4 = pnand %p1480_p9, %p1730_p8  ;;  %p1489_p1 = por %p1488_p12, %p1487_p11 }
  0x65   : > { %p1483_p10 = pneg %p1482_p4 }
  0x67   : > { %p1490_p3 = pnand %p1489_p1, %p1483_p10 }
  0x69   : > { %1493 = shalt.err (!%p1490_p3)
}
  0x6a   : > { %s2079_s9 = smov 64   ;;  %s1494_s21 = scalar_lea.vmem %s301_s22, 16 }
  0x6b   : > { %1266 = dma.hbm_to_vmem [thread:$0]  (!%p1714_p6), %s2064_s5, 1024, %s284_s19, [#allocation10], %s2079_s9, %s2079_s9, %s2072_s13  }
  0x6c   : > { %p1495_p13 = scmp.ne.s32.totalorder %s301_s22, %s1494_s21  ;;  %p1502_p5 = scmp.lt.s32.totalorder %s301_s22, %s301_s22 }
  0x6d   : > { %p1503_p7 = scmp.lt.s32.totalorder %s1494_s21, %s1494_s21 }
  0x6e   : > { %p1497_p0 = pnand %p1495_p13, %p1730_p8 }
  0x6f   : > { %p1504_p9 = por %p1503_p7, %p1502_p5 }
  0x70   : > { %p1498_p2 = pneg %p1497_p0 }
  0x72   : > { %p1505_p1 = pnand %p1504_p9, %p1498_p2 }
  0x74   : > { %1508 = shalt.err (!%p1505_p1)
}
  0x75   : > { %s1625_s24 = smov [#allocation12]   ;;  %s1080_s23 = sadd.s32 4294967294, %s1617_s30  }
  0x76   : > { %1269 = dma.vmem_to_smem (!%p1714_p6), %s301_s22, 16, %s1625_s24, [#allocation5]  }
  0x77   : > { %s1833_s19 = sadd.s32 1, %s1617_s30   ;;  %s34_s15 = sadd.s32 1, %s1613_s29 }
  0x78   : > { %s31_s25 = ssub.s32 %s1617_s30, %s1833_s19  ;;  %p41_p3 = scmp.ne.s32.totalorder %s1613_s29, %s1609_s28 }
  0x79   : > { %p32_p8 = scmp.eq.s32.totalorder %s31_s25, 0  ;;  %p42_p4 = scmp.eq.s32.totalorder %s1617_s30, 0 }
  0x7a   : > { %p47_p10 = scmp.ne.s32.totalorder %s1609_s28, %s1605_s27  ;;  %p218_p11 = scmp.eq.s32.totalorder %s1698_s11, 1 }
  0x7b   : > { %s1845_s26 = scalar_select %p32_p8, %s1613_s29, %s34_s15  }
  0x7c   : > { %p43_p12 = por %p42_p4, %p41_p3  ;;  %p2080_p13 = scmp.eq.s32.totalorder %s1698_s11, 0 }
  0x7d   : > { %p1853_p6 = por %p218_p11, %p41_p3  ;;  %p224_p2 = scmp.eq.s32.totalorder %s1080_s23, 1 }
  0x7e   : > { %p1849_p0 = por %p2080_p13, %p47_p10  ;;  %p1283_p5 = scmp.lt.s32.totalorder %s1617_s30, 2 }
  0x7f   : > { %s2082_s22 = scalar_select %p1853_p6, 1, 0 }
  0x80   : > { %s311_s17 = sand.u32 1, %s1613_s29   ;;  %p1859_p7 = por %p224_p2, %p47_p10 }
  0x81   : > { %s1088_s16 = sshll.u32 %s311_s17, 3  ;;  %s1141_s18 = sshll.u32 %s1617_s30, 7 }
  0x82   : > { %s2083_s10 = scalar_select %p1859_p7, 1, 0 }
  0x83   : > { %s1867_s24 = scalar_lea.hbm %s2059_s0, %s1141_s18  ;;  %s315_s15 = scalar_lea.vmem [#allocation2], %s1088_s16 }
  0x84   : > { %s322_s25 = sshll.u32 %s315_s15, 4  ;;  %p1869_p9 = pnand %p1283_p5, %p43_p12  ;;  %s1873_s25 = int_to_ptr.vmem [resolvable:$true] %s322_s25 }
  0x85   : > { %s1875_s13 = scalar_lea.sflag [#allocation3], %s311_s17  ;;  %s1509_s1 = scalar_lea.hbm %s1867_s24, 128 }
  0x86   : > { %p1510_p1 = scmp.ne.s32.totalorder %s1867_s24, %s1509_s1  ;;  %p1511_p3 = pneg %p1869_p9 }
  0x87   : > { %s1514_s20 = scalar_lea.hbm %s2059_s0, 256  ;;  %p1515_p10 = scmp.lt.u32.totalorder %s1867_s24, %s2059_s0 }
  0x88   : > { %p1512_p8 = pnand %p1511_p3, %p1510_p1  ;;  %p1516_p11 = scmp.lt.u32.totalorder %s1514_s20, %s1509_s1 }
  0x89   : > { %p1518_p13 = scmp.lt.u32.totalorder %s1509_s1, %s1867_s24 }
  0x8a   : > { %p1513_p4 = pneg %p1512_p8  ;;  %p1517_p12 = por %p1516_p11, %p1515_p10 }
  0x8c   : > { %p1519_p2 = por %p1518_p13, %p1517_p12 }
  0x8e   : > { %p1520_p5 = pnand %p1519_p2, %p1513_p4 }
  0x90   : > { %1523 = shalt.err (!%p1520_p5)
}
  0x91   : > { %s1524_s17 = scalar_lea.vmem %s1873_s25, 128  ;;  %s1626_s16 = smov [#allocation2]  }
  0x92   : > { %p1525_p1 = scmp.ne.s32.totalorder %s1873_s25, %s1524_s17  ;;  %s1529_s18 = sshll.u32 %s1626_s16, 4  ;;  %s1530_s18 = int_to_ptr.vmem [resolvable:$false] %s1529_s18 }
  0x93   : > { %s1531_s21 = scalar_lea.vmem %s1530_s18, 256  ;;  %p1532_p6 = scmp.lt.s32.totalorder %s1873_s25, %s1530_s18 }
  0x94   : > { %p1527_p8 = pnand %p1525_p1, %p1511_p3  ;;  %p1533_p10 = scmp.lt.s32.totalorder %s1531_s21, %s1524_s17 }
  0x96   : > { %p1528_p7 = pneg %p1527_p8  ;;  %p1534_p11 = por %p1533_p10, %p1532_p6 }
  0x98   : > { %p1535_p12 = pnand %p1534_p11, %p1528_p7 }
  0x9a   : > { %1538 = shalt.err (!%p1535_p12)
}
  0x9b   : > { %s2085_s1 = smov 4   ;;  %p2086_p3 = scmp.ne.s32.totalorder %s2075_s12, 0 }
  0x9c   : > { %1273 = dma.hbm_to_vmem [thread:$0]  (!%p1869_p9), %s1867_s24, 128, %s1873_s25, %s1875_s13, %s2079_s9, %s2079_s9, %s2085_s1  }
  0x9d   : > { %334 = sbr.rel (%p2086_p3) target bundleno = 1890 (0x762), region = 52  ;;  %s1909_s20 = sand.u32 (!%p2086_p3), 1, %s1609_s28  }
  0x9e   : > { %s1092_s15 = sshll.u32 (!%p2086_p3), %s1909_s20, 3  ;;  %s337_s17 = scalar_lea.sflag (!%p2086_p3), [#allocation3], %s1909_s20 }
  0x9f   : > { %s1913_s16 = scalar_lea.vmem (!%p2086_p3), [#allocation2], %s1092_s15 }
  0xa4   : > { %1584 = dma.done.wait (%p1849_p0), %s337_s17, 128  }
  0xa5   : > { %1586 = vsyncadd (%p1849_p0), %s337_s17, 4294967168  ;;  %p2087_p6 = scmp.eq.s32.totalorder %s1698_s11, 0 }
  0xa7   : > { %1588 = dma.done.wait (%p2087_p6), [#allocation7], 1152   ;;  %p2088_p7 = pmov %p2087_p6 }
  0xa8   : > { %p2089_p9 = pmov %p2087_p6 }
  0xa9   : > { %1590 = vsyncadd (%p2088_p7), [#allocation7], 4294966144 }
  0xaa   : > { %1592 = dma.done.wait (%p2089_p9), [#allocation10], 2048   ;;  %p2090_p4 = pmov %p2087_p6 }
  0xac   : > { %1594 = vsyncadd (%p2090_p4), [#allocation10], 4294965248  ;;  %p2091_p13 = pmov %p2090_p4 }
  0xad   : > { %p2092_p2 = pmov %p2090_p4 }
  0xae   : > { %1596 = dma.done.wait (%p2091_p13), [#allocation5], 16  }
  0xaf   : > { %1598 = vsyncadd (%p2092_p2), [#allocation5], 4294967280 }
  0xb0   : > { %365 = sfence }
  0xb1   : > { %v1333_v0 = vld [vmem:[#allocation6] sm:$0xff]   ;;  %v1627_v1 = vmov 0.0   ;;  %v1334_v2 = vld [vmem:[#allocation6 + $0x8] sm:$0xff]   ;;  %vm1628_vm0 = vmmov 0   ;;  %v1335_v3 = vld [vmem:[#allocation6 + $0x10] sm:$0xff]   ;;  %v525_v17 = vlaneseq  ;;  %s1099_s12 = sld [smem:[#allocation12 + $0x1]] }
  0xb2   : > { %1170 = vmatprep.subr.bf16.mxu0 %v1627_v1  ;;  %1190 = vmatprep.subr.bf16.mxu1 %v1627_v1  ;;  %v1336_v4 = vld [vmem:[#allocation6 + $0x18] sm:$0xff]   ;;  %v1337_v5 = vld [vmem:[#allocation6 + $0x20] sm:$0xff]   ;;  %v1338_v6 = vld [vmem:[#allocation6 + $0x28] sm:$0xff]   ;;  %s397_s13 = sld [smem:[#allocation12]]  ;;  %s1142_s9 = sshll.u32 %s1698_s11, 8 }
  0xb3   : > { %1171 = vmatpush3.bf16.msra.mxu0 %v1333_v0  ;;  %1186 = vmatprep.mubr.msk.bf16.mxu0 %vm1628_vm0, %v1627_v1  ;;  %v1339_v7 = vld [vmem:[#allocation6 + $0x30] sm:$0xff]   ;;  %v1340_v8 = vld [vmem:[#allocation6 + $0x38] sm:$0xff]   ;;  %v1100_v10 = vld [vmem:[#allocation8] ss:$0 sm:$0xff]  ;;  %v1948_v18 = vand.u32 127, %v525_v17  ;;  %s2013_s18 = scalar_lea.hbm %s2067_s8, %s1142_s9  ;;  %s944_s11 = scalar_lea.sflag [#allocation4], %s1909_s20 }
  0xb4   : > { %1172 = vmatprep.subr.bf16.mxu0 %v1627_v1  ;;  %1206 = vmatprep.mubr.msk.bf16.mxu1 %vm1628_vm0, %v1627_v1  ;;  %v1341_v9 = vld [vmem:[%s1913_s16] sm:$0xff]   ;;  %v1342_v30 = vld [vmem:[#allocation9] sm:$0xff]   ;;  %v1345_v33 = vld [vmem:[#allocation9 + $0x18] sm:$0xff]   ;;  %p2093_p5 = scmp.ne.s32.totalorder %s2082_s22, 0  ;;  %s1629_s1 = smov [#allocation13]  }
  0xb5   : > { %vm527_vm1 = vcmp.lt.s32.totalorder %v1948_v18, 32  ;;  %1191 = vmatpush3.bf16.msra.mxu1 %v1342_v30  ;;  %v1343_v31 = vld [vmem:[#allocation9 + $0x8] sm:$0xff]   ;;  %v1344_v32 = vld [vmem:[#allocation9 + $0x10] sm:$0xff]   ;;  %v1346_v34 = vld [vmem:[#allocation9 + $0x20] sm:$0xff]   ;;  %s1543_s15 = sshll.u32 %s1629_s1, 4  ;;  %s1544_s15 = int_to_ptr.vmem [resolvable:$false] %s1543_s15 }
  0xb6   : > { %v1952_v21 = vsel %vm527_vm1, 1.0, %v1627_v1  ;;  %1192 = vmatprep.subr.bf16.mxu1 %v1627_v1  ;;  %v1347_v35 = vld [vmem:[#allocation9 + $0x28] sm:$0xff]   ;;  %v1348_v36 = vld [vmem:[#allocation9 + $0x30] sm:$0xff]   ;;  %v1349_v37 = vld [vmem:[#allocation9 + $0x38] sm:$0xff]   ;;  %s1545_s17 = scalar_lea.vmem %s1544_s15, 512 }
  0xb7   : > { %1173 = vmatpush3.bf16.msra.mxu0 %v1334_v2  ;;  %v1111_v45 = vld [vmem:[#allocation8 + $0x1] ss:$0 sm:$0xff]  ;;  %v1112_v47 = vld [vmem:[#allocation8 + $0x2] ss:$0 sm:$0xff]  ;;  %v1963_v50 = vstv %s1099_s12 }
  0xb8   : > { %1174 = vmatprep.subr.bf16.mxu0 %v1627_v1  ;;  %v1967_v59 = vstv %s397_s13  ;;  %s1098_s13 = sshll.u32 %s1909_s20, 4 }
  0xb9   : > { %1193 = vmatpush3.bf16.msra.mxu1 %v1343_v31  ;;  %v1350_v31 = vld [vmem:[#allocation11] sm:$0xff]   ;;  %s393_s14 = scalar_lea.vmem [#allocation13], %s1098_s13 }
  0xba   : > { %1194 = vmatprep.subr.bf16.mxu1 %v1627_v1  ;;  %s957_s24 = sshll.u32 %s393_s14, 4  ;;  %s2015_s24 = int_to_ptr.vmem [resolvable:$true] %s957_s24 }
  0xbb   : > { %1175 = vmatpush3.bf16.msra.mxu0 %v1335_v3  ;;  %s1539_s21 = scalar_lea.vmem %s2015_s24, 256  ;;  %p1546_p10 = scmp.lt.s32.totalorder %s2015_s24, %s1544_s15 }
  0xbc   : > { %1176 = vmatprep.subr.bf16.mxu0 %v1627_v1  ;;  %p1540_p0 = scmp.ne.s32.totalorder %s2015_s24, %s1539_s21  ;;  %p1547_p11 = scmp.lt.s32.totalorder %s1545_s17, %s1539_s21 }
  0xbd   : > { %1195 = vmatpush3.bf16.msra.mxu1 %v1344_v32  ;;  %v1351_v32 = vld [vmem:[#allocation11 + $0x8] sm:$0xff]  }
  0xbe   : > { %1196 = vmatprep.subr.bf16.mxu1 %v1627_v1  ;;  %p1541_p1 = pnand %p1540_p0, %p2093_p5  ;;  %p1548_p12 = por %p1547_p11, %p1546_p10 }
  0xbf   : > { %1177 = vmatpush3.bf16.msra.mxu0 %v1336_v4 }
  0xc0   : > { %1178 = vmatprep.subr.bf16.mxu0 %v1627_v1  ;;  %p1542_p8 = pneg %p1541_p1 }
  0xc1   : > { %1197 = vmatpush3.bf16.msra.mxu1 %v1345_v33  ;;  %v1352_v33 = vld [vmem:[#allocation11 + $0x10] sm:$0xff]  }
  0xc2   : > { %1198 = vmatprep.subr.bf16.mxu1 %v1627_v1  ;;  %p1549_p3 = pnand %p1548_p12, %p1542_p8 }
  0xc3   : > { %1179 = vmatpush3.bf16.msra.mxu0 %v1337_v5 }
  0xc4   : > { %1180 = vmatprep.subr.bf16.mxu0 %v1627_v1 }
  0xc5   : > { %1199 = vmatpush3.bf16.msra.mxu1 %v1346_v34  ;;  %v1353_v34 = vld [vmem:[#allocation11 + $0x18] sm:$0xff]  }
  0xc6   : > { %1200 = vmatprep.subr.bf16.mxu1 %v1627_v1 }
  0xc7   : > { %1181 = vmatpush3.bf16.msra.mxu0 %v1338_v6 }
  0xc8   : > { %1182 = vmatprep.subr.bf16.mxu0 %v1627_v1 }
  0xc9   : > { %1201 = vmatpush3.bf16.msra.mxu1 %v1347_v35  ;;  %v1354_v35 = vld [vmem:[#allocation11 + $0x20] sm:$0xff]  }
  0xca   : > { %1202 = vmatprep.subr.bf16.mxu1 %v1627_v1 }
  0xcb   : > { %1183 = vmatpush3.bf16.msra.mxu0 %v1339_v7 }
  0xcc   : > { %1184 = vmatprep.subr.bf16.mxu0 %v1627_v1 }
  0xcd   : > { %1203 = vmatpush3.bf16.msra.mxu1 %v1348_v36  ;;  %v1356_v36 = vld [vmem:[#allocation11 + $0x30] sm:$0xff]  }
  0xce   : > { %1204 = vmatprep.subr.bf16.mxu1 %v1627_v1 }
  0xcf   : > { %1185 = vmatpush3.bf16.msra.mxu0 %v1340_v8 }
  0xd0   : > { %1210 = vmatprep.subr.bf16.mxu0 %v1627_v1 }
  0xd1   : > { %1205 = vmatpush3.bf16.msra.mxu1 %v1349_v37  ;;  %v1357_v37 = vld [vmem:[#allocation11 + $0x38] sm:$0xff]  }
  0xd2   : > { %1187 = vmatmul.mubr.bf16.vlgmr.msra.gmra.mrb[0].mxu0 %v1341_v9 }
  0xd3   : > { %1226 = vmatprep.mubr.msk.bf16.mxu0 %vm1628_vm0, %v1627_v1  ;;  %1211 = vmatpush3.bf16.msra.mxu0 %v1350_v31 }
  0xd4   : > { %1212 = vmatprep.subr.bf16.mxu0 %v1627_v1 }
  0xd7   : > { %1213 = vmatpush3.bf16.msra.mxu0 %v1351_v32 }
  0xd8   : > { %1214 = vmatprep.subr.bf16.mxu0 %v1627_v1 }
  0xdb   : > { %1215 = vmatpush3.bf16.msra.mxu0 %v1352_v33 }
  0xdc   : > { %1216 = vmatprep.subr.bf16.mxu0 %v1627_v1 }
  0xdf   : > { %1217 = vmatpush3.bf16.msra.mxu0 %v1353_v34 }
  0xe0   : > { %1218 = vmatprep.subr.bf16.mxu0 %v1627_v1 }
  0xe3   : > { %1219 = vmatpush3.bf16.msra.mxu0 %v1354_v35 }
  0xe4   : > { %1220 = vmatprep.subr.bf16.mxu0 %v1627_v1 }
 0x1a5   : > { %v510_v11 = vpop.f32.mrb[0].mxu0 }
 0x1a6   : > { %v511_v12 = vadd.f32 %v1100_v10, %v510_v11  ;;  %v1188_v13 = vpop.f32.mrb[1].mxu0 }
 0x1a7   : > { %v513_v14 = vpop.f32.mrb[2].mxu0 }
 0x1a8   : > { %517 = vadd.xlane.f32.xlu0 %v511_v12  ;;  %v1189_v15 = vpop.f32.mrb[3].mxu0  ;;  %v514_v16 = vadd.f32 %v1100_v10, %v513_v14 }
 0x1ac   : > { %519 = vadd.xlane.f32.xlu0 %v514_v16 }
 0x235   : > { %v518_v19 = vpop.xlane.xlu0 %517 }
 0x236   : > { %v521_v20 = vmul.f32 0.03125, %v518_v19 }
 0x238   : > { %v523_v22 = vsub.f32 %v511_v12, %v521_v20  ;;  %v1113_v12 = vld [vmem:[%s2063_s4] ss:$0 sm:$0xff] }
 0x239   : > { %v520_v23 = vpop.xlane.xlu0 %519 }
 0x23a   : > { %v522_v24 = vmul.f32 0.03125, %v520_v23  ;;  %v530_v25 = vmul.f32 %v1952_v21, %v523_v22 }
 0x23c   : > { %v524_v26 = vsub.f32 %v514_v16, %v522_v24  ;;  %v532_v27 = vmul.f32 %v530_v25, %v530_v25 }
 0x23e   : > { %534 = vadd.xlane.f32.xlu1 %v532_v27  ;;  %v531_v28 = vmul.f32 %v1952_v21, %v524_v26 }
 0x240   : > { %v533_v29 = vmul.f32 %v531_v28, %v531_v28 }
 0x242   : > { %536 = vadd.xlane.f32.xlu1 %v533_v29 }
 0x2cb   : > { %v535_v38 = vpop.xlane.xlu1 %534 }
 0x2cc   : > { %v538_v39 = vmul.f32 0.03125, %v535_v38 }
 0x2ce   : > { %v540_v40 = vadd.f32 1e-05, %v538_v39 }
 0x2cf   : > { %v537_v41 = vpop.xlane.xlu1 %536 }
 0x2d0   : > { %1358 = vrsqrt.f32 %v540_v40  ;;  %v539_v42 = vmul.f32 0.03125, %v537_v41 }
 0x2d2   : > { %v541_v43 = vadd.f32 1e-05, %v539_v42 }
 0x2d4   : > { %1360 = vrsqrt.f32 %v541_v43 }
 0x2da   : > { %v1359_v44 = vpop.eup %1358 }
 0x2db   : > { %v544_v46 = vmul.f32 %v1359_v44, %v530_v25 }
 0x2dd   : > { %v551_v48 = vmul.f32 %v1111_v45, %v544_v46 }
 0x2de   : > { %v1361_v49 = vpop.eup %1360 }
 0x2df   : > { %v545_v51 = vmul.f32 %v1361_v49, %v531_v28  ;;  %v558_v52 = vadd.f32 %v1112_v47, %v551_v48  ;;  %v1123_v48 = vld [vmem:[%s2063_s4 + $0x2] ss:$0 sm:$0xff] }
 0x2e1   : > { %v552_v53 = vmul.f32 %v1111_v45, %v545_v51  ;;  %v566_v54 = vmul.f32 %v1963_v50, %v558_v52  ;;  %v563_v60 = vmul.f32 %v1967_v59, %v558_v52  ;;  %vm560_vm2 = vcmp.ge.f32.partialorder %v558_v52, 0.0  ;;  %v1122_v45 = vld [vmem:[%s2063_s4 + $0x1] ss:$0 sm:$0xff] }
 0x2e3   : > { %v559_v55 = vadd.f32 %v1112_v47, %v552_v53  ;;  %v568_v56 = vmul.f32 1.442695, %v566_v54 }
 0x2e5   : > { %v567_v57 = vmul.f32 %v1963_v50, %v559_v55  ;;  %1362 = vpow2.f32 %v568_v56  ;;  %v564_v63 = vmul.f32 %v1967_v59, %v559_v55  ;;  %vm561_vm4 = vcmp.ge.f32.partialorder %v559_v55, 0.0 }
 0x2e7   : > { %v570_v58 = vmul.f32 1.442695, %v567_v57 }
 0x2e9   : > { %1364 = vpow2.f32 %v570_v58 }
 0x2ef   : > { %v1363_v61 = vpop.eup %1362 }
 0x2f0   : > { %v572_v62 = vmul.f32 %v1363_v61, %v563_v60 }
 0x2f2   : > { %v574_v0 = vsel %vm560_vm2, %v558_v52, %v572_v62  ;;  %vm882_vm2 = vcmp.lt.s32.totalorder %v1948_v18, 8 }
 0x2f3   : > { %v1365_v2 = vpop.eup %1364  ;;  %vm576_vm3 = vcmp.ne.f32.partialorder %v574_v0, %v574_v0 }
 0x2f4   : > { %v573_v3 = vmul.f32 %v1365_v2, %v564_v63  ;;  %v578_v4 = vsel %vm576_vm3, 0.0, %v574_v0 }
 0x2f5   : > { %vm580_vm5 = vcmp.eq.f32.partialorder %v578_v4, inf }
 0x2f6   : > { %v575_v5 = vsel %vm561_vm4, %v559_v55, %v573_v3  ;;  %v582_v6 = vsel %vm580_vm5, 3.4028235e+38, %v578_v4 }
 0x2f7   : > { %vm577_vm6 = vcmp.ne.f32.partialorder %v575_v5, %v575_v5  ;;  %vm584_vm8 = vcmp.eq.f32.partialorder %v582_v6, -inf }
 0x2f8   : > { %v579_v7 = vsel %vm577_vm6, 0.0, %v575_v5  ;;  %v586_v9 = vsel %vm584_vm8, -3.4028235e+38, %v582_v6 }
 0x2f9   : > { %vm581_vm7 = vcmp.eq.f32.partialorder %v579_v7, inf }
 0x2fa   : > { %v583_v8 = vsel %vm581_vm7, 3.4028235e+38, %v579_v7 }
 0x2fb   : > { %vm585_vm9 = vcmp.eq.f32.partialorder %v583_v8, -inf }
 0x2fc   : > { %v587_v10 = vsel %vm585_vm9, -3.4028235e+38, %v583_v8 }
 0x2fd   : > { %v588_v11 = vpack.c.bf16 %v587_v10, %v586_v9 }
 0x2ff   : > { %1207 = vmatmul.mubr.bf16.vlgmr.msra.gmra.mrb[0].mxu1 %v588_v11 }
 0x3d2   : > { %v692_v13 = vpop.f32.mrb[0].mxu1 }
 0x3d3   : > { %v693_v14 = vadd.f32 %v1113_v12, %v692_v13  ;;  %v1208_v15 = vpop.f32.mrb[1].mxu1 }
 0x3d4   : > { %v695_v16 = vpop.f32.mrb[2].mxu1 }
 0x3d5   : > { %v696_v17 = vadd.f32 %v1113_v12, %v695_v16  ;;  %699 = vadd.xlane.f32.xlu0 %v693_v14  ;;  %v1209_v19 = vpop.f32.mrb[3].mxu1  ;;  %v1124_v12 = vld [vmem:[%s2065_s6] ss:$0 sm:$0xff] }
 0x3d7   : > { %701 = vadd.xlane.f32.xlu1 %v696_v17 }
 0x462   : > { %v700_v20 = vpop.xlane.xlu0 %699 }
 0x463   : > { %v703_v22 = vmul.f32 0.03125, %v700_v20 }
 0x464   : > { %v702_v23 = vpop.xlane.xlu1 %701 }
 0x465   : > { %v705_v24 = vsub.f32 %v693_v14, %v703_v22  ;;  %v704_v25 = vmul.f32 0.03125, %v702_v23 }
 0x467   : > { %v706_v26 = vsub.f32 %v696_v17, %v704_v25  ;;  %v707_v27 = vmul.f32 %v1952_v21, %v705_v24  ;;  %v1133_v24 = vsel %vm882_vm2, 1.0, %v1627_v1 }
 0x469   : > { %v709_v28 = vmul.f32 %v707_v27, %v707_v27  ;;  %v708_v29 = vmul.f32 %v1952_v21, %v706_v26  ;;  %v1355_v21 = vld [vmem:[#allocation11 + $0x28] sm:$0xff]  }
 0x46a   : > { %1221 = vmatpush3.bf16.msra.mxu0 %v1355_v21 }
 0x46b   : > { %711 = vadd.xlane.f32.xlu0 %v709_v28  ;;  %v710_v30 = vmul.f32 %v708_v29, %v708_v29  ;;  %1222 = vmatprep.subr.bf16.mxu0 %v1627_v1 }
 0x46d   : > { %713 = vadd.xlane.f32.xlu1 %v710_v30 }
 0x46e   : > { %1223 = vmatpush3.bf16.msra.mxu0 %v1356_v36 }
 0x46f   : > { %1224 = vmatprep.subr.bf16.mxu0 %v1627_v1  ;;  %v1134_v1 = vld [vmem:[%s2065_s6 + $0x1] ss:$0 sm:$0xff] }
 0x472   : > { %1225 = vmatpush3.bf16.msra.mxu0 %v1357_v37 }
 0x4f8   : > { %v712_v38 = vpop.xlane.xlu0 %711 }
 0x4f9   : > { %v715_v39 = vmul.f32 0.03125, %v712_v38 }
 0x4fa   : > { %v714_v40 = vpop.xlane.xlu1 %713 }
 0x4fb   : > { %v717_v41 = vadd.f32 1e-05, %v715_v39  ;;  %v716_v42 = vmul.f32 0.03125, %v714_v40  ;;  %v1135_v39 = vld [vmem:[%s2065_s6 + $0x2] ss:$0 sm:$0xff] }
 0x4fd   : > { %1366 = vrsqrt.f32 %v717_v41  ;;  %v718_v43 = vadd.f32 1e-05, %v716_v42 }
 0x4ff   : > { %1368 = vrsqrt.f32 %v718_v43 }
 0x507   : > { %v1367_v44 = vpop.eup %1366 }
 0x508   : > { %v721_v46 = vmul.f32 %v1367_v44, %v707_v27 }
 0x509   : > { %v1369_v47 = vpop.eup %1368 }
 0x50a   : > { %v728_v49 = vmul.f32 %v1122_v45, %v721_v46  ;;  %v722_v51 = vmul.f32 %v1369_v47, %v708_v29 }
 0x50c   : > { %v735_v52 = vadd.f32 %v1123_v48, %v728_v49  ;;  %v729_v53 = vmul.f32 %v1122_v45, %v722_v51 }
 0x50e   : > { %v741_v54 = vmul.f32 %v735_v52, %v1963_v50  ;;  %v736_v55 = vadd.f32 %v1123_v48, %v729_v53  ;;  %v739_v60 = vmul.f32 %v735_v52, %v1967_v59  ;;  %vm737_vm10 = vcmp.ge.f32.partialorder %v735_v52, 0.0 }
 0x510   : > { %v743_v56 = vmul.f32 1.442695, %v741_v54  ;;  %v742_v57 = vmul.f32 %v736_v55, %v1963_v50  ;;  %v740_v62 = vmul.f32 %v736_v55, %v1967_v59  ;;  %vm738_vm11 = vcmp.ge.f32.partialorder %v736_v55, 0.0 }
 0x512   : > { %1370 = vpow2.f32 %v743_v56  ;;  %v745_v58 = vmul.f32 1.442695, %v742_v57 }
 0x514   : > { %1372 = vpow2.f32 %v745_v58 }
 0x51c   : > { %v1371_v61 = vpop.eup %1370 }
 0x51d   : > { %v747_v63 = vmul.f32 %v1371_v61, %v739_v60 }
 0x51e   : > { %v1373_v0 = vpop.eup %1372 }
 0x51f   : > { %v748_v2 = vmul.f32 %v1373_v0, %v740_v62  ;;  %v749_v3 = vsel %vm737_vm10, %v735_v52, %v747_v63 }
 0x520   : > { %vm751_vm12 = vcmp.ne.f32.partialorder %v749_v3, %v749_v3 }
 0x521   : > { %v750_v4 = vsel %vm738_vm11, %v736_v55, %v748_v2  ;;  %v753_v5 = vsel %vm751_vm12, 0.0, %v749_v3 }
 0x522   : > { %vm752_vm13 = vcmp.ne.f32.partialorder %v750_v4, %v750_v4  ;;  %vm755_vm14 = vcmp.eq.f32.partialorder %v753_v5, inf }
 0x523   : > { %v754_v6 = vsel %vm752_vm13, 0.0, %v750_v4  ;;  %v757_v7 = vsel %vm755_vm14, 3.4028235e+38, %v753_v5 }
 0x524   : > { %vm756_vm15 = vcmp.eq.f32.partialorder %v754_v6, inf  ;;  %vm759_vm0 = vcmp.eq.f32.partialorder %v757_v7, -inf }
 0x525   : > { %v758_v8 = vsel %vm756_vm15, 3.4028235e+38, %v754_v6  ;;  %v761_v9 = vsel %vm759_vm0, -3.4028235e+38, %v757_v7 }
 0x526   : > { %vm760_vm1 = vcmp.eq.f32.partialorder %v758_v8, -inf }
 0x527   : > { %v762_v10 = vsel %vm760_vm1, -3.4028235e+38, %v758_v8 }
 0x528   : > { %v763_v11 = vpack.c.bf16 %v762_v10, %v761_v9 }
 0x52a   : > { %1227 = vmatmul.mubr.bf16.vlgmr.msra.gmra.mrb[4].mxu0 %v763_v11 }
 0x5fd   : > { %v867_v13 = vpop.f32.mrb[4].mxu0 }
 0x5fe   : > { %v868_v14 = vadd.f32 %v1124_v12, %v867_v13  ;;  %v1228_v15 = vpop.f32.mrb[5].mxu0 }
 0x5ff   : > { %v870_v16 = vpop.f32.mrb[6].mxu0 }
 0x600   : > { %v871_v17 = vadd.f32 %v1124_v12, %v870_v16  ;;  %874 = vadd.xlane.f32.xlu0 %v868_v14  ;;  %v1229_v19 = vpop.f32.mrb[7].mxu0 }
 0x602   : > { %876 = vadd.xlane.f32.xlu1 %v871_v17 }
 0x68d   : > { %v875_v20 = vpop.xlane.xlu0 %874 }
 0x68e   : > { %v878_v22 = vmul.f32 0.125, %v875_v20 }
 0x68f   : > { %v877_v23 = vpop.xlane.xlu1 %876 }
 0x690   : > { %v880_v25 = vsub.f32 %v868_v14, %v878_v22  ;;  %v879_v26 = vmul.f32 0.125, %v877_v23 }
 0x692   : > { %v881_v27 = vsub.f32 %v871_v17, %v879_v26  ;;  %v885_v28 = vmul.f32 %v1133_v24, %v880_v25 }
 0x694   : > { %v887_v29 = vmul.f32 %v885_v28, %v885_v28  ;;  %v886_v30 = vmul.f32 %v1133_v24, %v881_v27 }
 0x696   : > { %889 = vadd.xlane.f32.xlu0 %v887_v29  ;;  %v888_v31 = vmul.f32 %v886_v30, %v886_v30 }
 0x698   : > { %891 = vadd.xlane.f32.xlu1 %v888_v31 }
 0x723   : > { %v890_v32 = vpop.xlane.xlu0 %889 }
 0x724   : > { %v893_v33 = vmul.f32 0.125, %v890_v32 }
 0x725   : > { %v892_v34 = vpop.xlane.xlu1 %891 }
 0x726   : > { %v895_v35 = vadd.f32 1e-05, %v893_v33  ;;  %v894_v21 = vmul.f32 0.125, %v892_v34 }
 0x728   : > { %1374 = vrsqrt.f32 %v895_v35  ;;  %v896_v18 = vadd.f32 1e-05, %v894_v21 }
 0x72a   : > { %1376 = vrsqrt.f32 %v896_v18 }
 0x732   : > { %v1375_v36 = vpop.eup %1374 }
 0x733   : > { %v899_v37 = vmul.f32 %v1375_v36, %v885_v28 }
 0x734   : > { %v1377_v38 = vpop.eup %1376 }
 0x735   : > { %v906_v40 = vmul.f32 %v1134_v1, %v899_v37  ;;  %v900_v41 = vmul.f32 %v1377_v38, %v886_v30 }
 0x737   : > { %v913_v42 = vadd.f32 %v1135_v39, %v906_v40  ;;  %v907_v43 = vmul.f32 %v1134_v1, %v900_v41 }
 0x739   : > { %v919_v44 = vmul.f32 %v913_v42, %v1963_v50  ;;  %v914_v45 = vadd.f32 %v1135_v39, %v907_v43  ;;  %v917_v49 = vmul.f32 %v913_v42, %v1967_v59  ;;  %vm915_vm3 = vcmp.ge.f32.partialorder %v913_v42, 0.0 }
 0x73b   : > { %v921_v46 = vmul.f32 1.442695, %v919_v44  ;;  %v920_v47 = vmul.f32 %v914_v45, %v1963_v50  ;;  %v918_v52 = vmul.f32 %v914_v45, %v1967_v59  ;;  %vm916_vm4 = vcmp.ge.f32.partialorder %v914_v45, 0.0 }
 0x73d   : > { %1378 = vpow2.f32 %v921_v46  ;;  %v923_v48 = vmul.f32 1.442695, %v920_v47 }
 0x73f   : > { %1380 = vpow2.f32 %v923_v48 }
 0x747   : > { %v1379_v51 = vpop.eup %1378 }
 0x748   : > { %v925_v53 = vmul.f32 %v1379_v51, %v917_v49 }
 0x749   : > { %v1381_v54 = vpop.eup %1380 }
 0x74a   : > { %v926_v55 = vmul.f32 %v1381_v54, %v918_v52  ;;  %v927_v56 = vsel %vm915_vm3, %v913_v42, %v925_v53 }
 0x74b   : > { %vm929_vm5 = vcmp.ne.f32.partialorder %v927_v56, %v927_v56 }
 0x74c   : > { %v928_v57 = vsel %vm916_vm4, %v914_v45, %v926_v55  ;;  %v931_v58 = vsel %vm929_vm5, 0.0, %v927_v56 }
 0x74d   : > { %vm930_vm6 = vcmp.ne.f32.partialorder %v928_v57, %v928_v57  ;;  %vm933_vm7 = vcmp.eq.f32.partialorder %v931_v58, inf }
 0x74e   : > { %v932_v50 = vsel %vm930_vm6, 0.0, %v928_v57  ;;  %v935_v60 = vsel %vm933_vm7, 3.4028235e+38, %v931_v58 }
 0x74f   : > { %vm934_vm8 = vcmp.eq.f32.partialorder %v932_v50, inf  ;;  %vm937_vm9 = vcmp.eq.f32.partialorder %v935_v60, -inf }
 0x750   : > { %v936_v59 = vsel %vm934_vm8, 3.4028235e+38, %v932_v50  ;;  %v939_v61 = vsel %vm937_vm9, -3.4028235e+38, %v935_v60 }
 0x751   : > { %vm938_vm10 = vcmp.eq.f32.partialorder %v936_v59, -inf  ;;  %941 = vst [vmem:[%s393_s14] sm:$0xff] %v939_v61 }
 0x752   : > { %v940_v62 = vsel %vm938_vm10, -3.4028235e+38, %v936_v59 }
 0x753   : > { %942 = vst [vmem:[%s393_s14 + $0x8] sm:$0xff] %v940_v62 }
 0x754   : > { %1552 = shalt.err (!%p1549_p3)
}
 0x755   : > { %s1553_s16 = scalar_lea.hbm %s2013_s18, 256  ;;  %s1557_s9 = scalar_lea.hbm %s2067_s8, 512 }
 0x756   : > { %p1554_p6 = scmp.ne.s32.totalorder %s2013_s18, %s1553_s16  ;;  %p1558_p4 = scmp.lt.u32.totalorder %s2013_s18, %s2067_s8 }
 0x757   : > { %p1559_p13 = scmp.lt.u32.totalorder %s1557_s9, %s1553_s16  ;;  %p1561_p0 = scmp.lt.u32.totalorder %s1553_s16, %s2013_s18 }
 0x758   : > { %p1555_p7 = pnand %p1554_p6, %p2093_p5 }
 0x759   : > { %p1560_p2 = por %p1559_p13, %p1558_p4 }
 0x75a   : > { %p1556_p9 = pneg %p1555_p7 }
 0x75b   : > { %p1562_p1 = por %p1561_p0, %p1560_p2 }
 0x75d   : > { %p1563_p8 = pnand %p1562_p1, %p1556_p9 }
 0x75f   : > { %1566 = shalt.err (!%p1563_p8)
}
 0x760   : > { %s1630_s23 = smov 128   ;;  %s1631_s21 = smov 8  }
 0x761   : > { %1252 = dma.vmem_to_hbm [thread:$0]  (%p2093_p5), %s2015_s24, 256, %s2013_s18, %s944_s11, %s1630_s23, %s1630_s23, %s1631_s21  }
 0x762 PF: > { %s972_s1 = sand.u32 1, %s1605_s27   ;;  %p2094_p10 = scmp.ne.s32.totalorder %s2083_s10, 0 }
 0x763   : > { %p2095_p11 = scmp.ge.s32.totalorder %s1617_s30, 2  ;;  %s973_s15 = scalar_lea.sflag [#allocation4], %s972_s1 }
 0x765   : > { %p1275_p12 = pnand %p2095_p11, %p2094_p10 }
 0x767   : > { %1600 = dma.done.wait (!%p1275_p12), %s973_s15, 256  }
 0x768   : > { %1602 = vsyncadd (!%p1275_p12), %s973_s15, 4294967040  ;;  %p24_p3 = scmp.ge.s32.totalorder %s1833_s19, 4   ;;  %s2096_s27 = smov %s1609_s28 }
 0x769   : > { %s2097_s28 = smov %s1613_s29  ;;  %s2098_s29 = smov %s1845_s26 }
 0x76a   : > { %s2099_s30 = smov %s1833_s19  ;;  %26 = sbr.rel (!%p24_p3) target bundleno = 10 (0xa), region = 118 }
 0x771   :  { %978 = vsyncpa [#allocation3], 1 }
 0x772   :  { %980 = vsyncpa [#allocation3 + $0x1], 1 }
 0x773   :  { %981 = vsyncpa [#allocation7], 1 }
 0x774   :  { %982 = vsyncpa [#allocation10], 1 }
 0x775   :  { %983 = vsyncpa [#allocation4], 1 }
 0x776   :  { %985 = vsyncpa [#allocation4 + $0x1], 1 }
 0x777   :  { %986 = vsyncpa [#allocation5], 1 }
 0x778   :  { %988 = vsyncpa [#allocation5 + $0x1], 1 }

// kernel: tpu_custom_call.1
= control target key start
LH: loop header
LB: loop body
LE: loop exit
PB: predicated region body
PF: predicated region fallthrough
CT: control target
= control target key end

     0   :  { %s2059_s0 = inlined_call_operand.hbm [shape: bf16[32,128], index: 0, kind: input, shape index: {}]   ;;  %s2060_s1 = inlined_call_operand.hbm [shape: bf16[128,128], index: 1, kind: input, shape index: {}]   ;;  %s2061_s2 = inlined_call_operand.hbm [shape: f32[8,128], index: 2, kind: input, shape index: {}]   ;;  %s2062_s3 = inlined_call_operand.hbm [shape: bf16[128,128], index: 3, kind: input, shape index: {}]   ;;  %s2063_s4 = inlined_call_operand.vmem [shape: f32[8,128], index: 4, kind: input, shape index: {}]   ;;  %s2064_s5 = inlined_call_operand.hbm [shape: bf16[128,128], index: 5, kind: input, shape index: {}]   ;;  %s2065_s6 = inlined_call_operand.vmem [shape: f32[8,128], index: 6, kind: input, shape index: {}]   ;;  %s2066_s7 = inlined_call_operand.vmem [shape: f32[2], index: 7, kind: input, shape index: {}]   ;;  %s2067_s8 = inlined_call_operand.hbm [shape: f32[32,128], index: 8, kind: output, shape index: {}]  }
   0x1   :  { %2074 = sst [smem:[#allocation19_spill]] %s2060_s1 }
   0x2   :  { %13 = vsyncpa [#allocation3], 0 }
   0x3   :  { %15 = vsyncpa [#allocation3 + $0x1], 0 }
   0x4   :  { %16 = vsyncpa [#allocation7], 0 }
   0x5   :  { %17 = vsyncpa [#allocation10], 0 }
   0x6   :  { %18 = vsyncpa [#allocation5], 0 }
   0x7   :  { %19 = vsyncpa [#allocation4], 0 }
   0x8   :  { %21 = vsyncpa [#allocation4 + $0x1], 0  ;;  %s1677_s27 = smov 0   ;;  %s1679_s28 = smov 0  }
   0x9   :  { %s1681_s29 = smov 0   ;;  %s1683_s30 = smov 0  }
   0xa LB: > { %s1619_s9 = smov [#allocation6]   ;;  %s1698_s11 = sadd.s32 4294967295, %s1617_s30   ;;  %s1617_s30 = sphi %s1683_s30, %s2099_s30   ;;  %s1613_s29 = sphi %s1681_s29, %s2098_s29   ;;  %s1609_s28 = sphi %s1679_s28, %s2097_s28   ;;  %s1605_s27 = sphi %s1677_s27, %s2096_s27  }
   0xb   : > { %s243_s10 = sshll.u32 %s1619_s9, 4  ;;  %p1081_p0 = scmp.ge.s32.totalorder %s1617_s30, 1  ;;  %s1703_s10 = int_to_ptr.vmem [resolvable:$true] %s243_s10 }
   0xc   : > { %p2070_p1 = scmp.eq.s32.totalorder %s1698_s11, 0  ;;  %p231_p2 = scmp.lt.s32.totalorder %s1617_s30, 3 }
   0xd   : > { %s1620_s13 = smov [#allocation9]   ;;  %s1621_s16 = smov [#allocation8]  }
   0xe   : > { %p1705_p3 = pnand %p1081_p0, %p231_p2  ;;  %s267_s14 = sshll.u32 %s1620_s13, 4  ;;  %s1718_s14 = int_to_ptr.vmem [resolvable:$true] %s267_s14 }
   0xf   : > { %s257_s17 = sshll.u32 %s1621_s16, 4  ;;  %s2077_s1 = sld [smem:[#allocation19_spill]]  ;;  %s1720_s17 = int_to_ptr.vmem [resolvable:$true] %s257_s17 }
  0x10   : > { %s2075_s12 = scalar_select %p1705_p3, 1, 0 }
  0x11   : > { %p1254_p5 = pneg %p1705_p3 }
  0x13   : > { %p1714_p6 = pnand %p1254_p5, %p2070_p1 }
  0x15   : > { %s1382_s20 = scalar_lea.hbm %s2077_s1, 1024  ;;  %p1730_p8 = pneg %p1714_p6 }
  0x16   : > { %p1383_p7 = scmp.ne.s32.totalorder %s2077_s1, %s1382_s20  ;;  %p1389_p11 = scmp.lt.u32.totalorder %s1382_s20, %s2077_s1 }
  0x18   : > { %p1385_p9 = pnand %p1730_p8, %p1383_p7 }
  0x1a   : > { %p1386_p10 = pneg %p1385_p9 }
  0x1c   : > { %p1391_p12 = pnand %p1389_p11, %p1386_p10 }
  0x1e   : > { %1394 = shalt.err (!%p1391_p12)
}
  0x1f   : > { %s1395_s26 = scalar_lea.vmem %s1703_s10, 1024  ;;  %p1403_p5 = scmp.lt.s32.totalorder %s1703_s10, %s1703_s10 }
  0x20   : > { %p1396_p13 = scmp.ne.s32.totalorder %s1703_s10, %s1395_s26  ;;  %p1404_p4 = scmp.lt.s32.totalorder %s1395_s26, %s1395_s26 }
  0x22   : > { %p1398_p0 = pnand %p1396_p13, %p1730_p8  ;;  %p1405_p7 = por %p1404_p4, %p1403_p5 }
  0x24   : > { %p1399_p2 = pneg %p1398_p0 }
  0x26   : > { %p1406_p9 = pnand %p1405_p7, %p1399_p2 }
  0x28   : > { %1409 = shalt.err (!%p1406_p9)
}
  0x29   : > { %s2068_s9 = smov 64   ;;  %s2072_s13 = smov 4  }
  0x2a   : > { %1257 = dma.hbm_to_vmem [thread:$0]  (!%p1714_p6), %s2077_s1, 1024, %s1703_s10, [#allocation7], %s2068_s9, %s2068_s9, %s2072_s13  }
  0x2b   : > { %s1410_s21 = scalar_lea.hbm %s2062_s3, 1024 }
  0x2c   : > { %p1411_p4 = scmp.ne.s32.totalorder %s2062_s3, %s1410_s21  ;;  %p1417_p12 = scmp.lt.u32.totalorder %s1410_s21, %s2062_s3 }
  0x2e   : > { %p1413_p10 = pnand %p1411_p4, %p1730_p8 }
  0x30   : > { %p1414_p11 = pneg %p1413_p10 }
  0x32   : > { %p1419_p13 = pnand %p1417_p12, %p1414_p11 }
  0x34   : > { %1422 = shalt.err (!%p1419_p13)
}
  0x35   : > { %s1423_s10 = scalar_lea.vmem %s1718_s14, 1024  ;;  %p1431_p7 = scmp.lt.s32.totalorder %s1718_s14, %s1718_s14 }
  0x36   : > { %p1424_p0 = scmp.ne.s32.totalorder %s1718_s14, %s1423_s10  ;;  %p1432_p9 = scmp.lt.s32.totalorder %s1423_s10, %s1423_s10 }
  0x38   : > { %p1426_p2 = pnand %p1424_p0, %p1730_p8  ;;  %p1433_p4 = por %p1432_p9, %p1431_p7 }
  0x3a   : > { %p1427_p5 = pneg %p1426_p2 }
  0x3c   : > { %p1434_p10 = pnand %p1433_p4, %p1427_p5 }
  0x3e   : > { %1437 = shalt.err (!%p1434_p10)
}
  0x3f   : > { %1263 = dma.hbm_to_vmem [thread:$0]  (!%p1714_p6), %s2062_s3, 1024, %s1718_s14, [#allocation10], %s2068_s9, %s2068_s9, %s2072_s13  }
  0x40   : > { %s1438_s21 = scalar_lea.hbm %s2061_s2, 128 }
  0x41   : > { %p1439_p11 = scmp.ne.s32.totalorder %s2061_s2, %s1438_s21  ;;  %p1445_p0 = scmp.lt.u32.totalorder %s1438_s21, %s2061_s2 }
  0x43   : > { %p1441_p12 = pnand %p1439_p11, %p1730_p8 }
  0x45   : > { %p1442_p13 = pneg %p1441_p12 }
  0x47   : > { %p1447_p2 = pnand %p1445_p0, %p1442_p13 }
  0x49   : > { %1450 = shalt.err (!%p1447_p2)
}
  0x4a   : > { %s1451_s14 = scalar_lea.vmem %s1720_s17, 128  ;;  %p1459_p4 = scmp.lt.s32.totalorder %s1720_s17, %s1720_s17 }
  0x4b   : > { %p1452_p5 = scmp.ne.s32.totalorder %s1720_s17, %s1451_s14  ;;  %p1460_p10 = scmp.lt.s32.totalorder %s1451_s14, %s1451_s14 }
  0x4d   : > { %p1454_p7 = pnand %p1452_p5, %p1730_p8  ;;  %p1461_p11 = por %p1460_p10, %p1459_p4 }
  0x4f   : > { %p1455_p9 = pneg %p1454_p7 }
  0x51   : > { %p1462_p12 = pnand %p1461_p11, %p1455_p9 }
  0x53   : > { %1465 = shalt.err (!%p1462_p12)
}
  0x54   : > { %1260 = dma.hbm_to_vmem [thread:$0]  (!%p1714_p6), %s2061_s2, 128, %s1720_s17, [#allocation7]  }
  0x55   : > { %s1624_s18 = smov [#allocation11]   ;;  %s300_s22 = sshll.u32 %s2066_s7, 4  ;;  %s301_s22 = int_to_ptr.vmem [resolvable:$true] %s300_s22 }
  0x56   : > { %s283_s19 = sshll.u32 %s1624_s18, 4  ;;  %s1466_s26 = scalar_lea.hbm %s2064_s5, 1024  ;;  %s284_s19 = int_to_ptr.vmem [resolvable:$true] %s283_s19 }
  0x57   : > { %p1467_p13 = scmp.ne.s32.totalorder %s2064_s5, %s1466_s26  ;;  %p1473_p5 = scmp.lt.u32.totalorder %s1466_s26, %s2064_s5 }
  0x59   : > { %p1469_p0 = pnand %p1467_p13, %p1730_p8 }
  0x5b   : > { %p1470_p2 = pneg %p1469_p0 }
  0x5d   : > { %p1475_p7 = pnand %p1473_p5, %p1470_p2 }
  0x5f   : > { %1478 = shalt.err (!%p1475_p7)
}
  0x60   : > { %s1479_s16 = scalar_lea.vmem %s284_s19, 1024  ;;  %p1487_p11 = scmp.lt.s32.totalorder %s284_s19, %s284_s19 }
  0x61   : > { %p1480_p9 = scmp.ne.s32.totalorder %s284_s19, %s1479_s16  ;;  %p1488_p12 = scmp.lt.s32.totalorder %s1479_s16, %s1479_s16 }
  0x63   : > { %p1482_p4 = pnand %p1480_p9, %p1730_p8  ;;  %p1489_p1 = por %p1488_p12, %p1487_p11 }
  0x65   : > { %p1483_p10 = pneg %p1482_p4 }
  0x67   : > { %p1490_p3 = pnand %p1489_p1, %p1483_p10 }
  0x69   : > { %1493 = shalt.err (!%p1490_p3)
}
  0x6a   : > { %s2079_s9 = smov 64   ;;  %s1494_s21 = scalar_lea.vmem %s301_s22, 16 }
  0x6b   : > { %1266 = dma.hbm_to_vmem [thread:$0]  (!%p1714_p6), %s2064_s5, 1024, %s284_s19, [#allocation10], %s2079_s9, %s2079_s9, %s2072_s13  }
  0x6c   : > { %p1495_p13 = scmp.ne.s32.totalorder %s301_s22, %s1494_s21  ;;  %p1502_p5 = scmp.lt.s32.totalorder %s301_s22, %s301_s22 }
  0x6d   : > { %p1503_p7 = scmp.lt.s32.totalorder %s1494_s21, %s1494_s21 }
  0x6e   : > { %p1497_p0 = pnand %p1495_p13, %p1730_p8 }
  0x6f   : > { %p1504_p9 = por %p1503_p7, %p1502_p5 }
  0x70   : > { %p1498_p2 = pneg %p1497_p0 }
  0x72   : > { %p1505_p1 = pnand %p1504_p9, %p1498_p2 }
  0x74   : > { %1508 = shalt.err (!%p1505_p1)
}
  0x75   : > { %s1625_s24 = smov [#allocation12]   ;;  %s1080_s23 = sadd.s32 4294967294, %s1617_s30  }
  0x76   : > { %1269 = dma.vmem_to_smem (!%p1714_p6), %s301_s22, 16, %s1625_s24, [#allocation5]  }
  0x77   : > { %s1833_s19 = sadd.s32 1, %s1617_s30   ;;  %s34_s15 = sadd.s32 1, %s1613_s29 }
  0x78   : > { %s31_s25 = ssub.s32 %s1617_s30, %s1833_s19  ;;  %p41_p3 = scmp.ne.s32.totalorder %s1613_s29, %s1609_s28 }
  0x79   : > { %p32_p8 = scmp.eq.s32.totalorder %s31_s25, 0  ;;  %p42_p4 = scmp.eq.s32.totalorder %s1617_s30, 0 }
  0x7a   : > { %p47_p10 = scmp.ne.s32.totalorder %s1609_s28, %s1605_s27  ;;  %p218_p11 = scmp.eq.s32.totalorder %s1698_s11, 1 }
  0x7b   : > { %s1845_s26 = scalar_select %p32_p8, %s1613_s29, %s34_s15  }
  0x7c   : > { %p43_p12 = por %p42_p4, %p41_p3  ;;  %p2080_p13 = scmp.eq.s32.totalorder %s1698_s11, 0 }
  0x7d   : > { %p1853_p6 = por %p218_p11, %p41_p3  ;;  %p224_p2 = scmp.eq.s32.totalorder %s1080_s23, 1 }
  0x7e   : > { %p1849_p0 = por %p2080_p13, %p47_p10  ;;  %p1283_p5 = scmp.lt.s32.totalorder %s1617_s30, 2 }
  0x7f   : > { %s2082_s22 = scalar_select %p1853_p6, 1, 0 }
  0x80   : > { %s311_s17 = sand.u32 1, %s1613_s29   ;;  %p1859_p7 = por %p224_p2, %p47_p10 }
  0x81   : > { %s1088_s16 = sshll.u32 %s311_s17, 3  ;;  %s1141_s18 = sshll.u32 %s1617_s30, 7 }
  0x82   : > { %s2083_s10 = scalar_select %p1859_p7, 1, 0 }
  0x83   : > { %s1867_s24 = scalar_lea.hbm %s2059_s0, %s1141_s18  ;;  %s315_s15 = scalar_lea.vmem [#allocation2], %s1088_s16 }
  0x84   : > { %s322_s25 = sshll.u32 %s315_s15, 4  ;;  %p1869_p9 = pnand %p1283_p5, %p43_p12  ;;  %s1873_s25 = int_to_ptr.vmem [resolvable:$true] %s322_s25 }
  0x85   : > { %s1875_s13 = scalar_lea.sflag [#allocation3], %s311_s17  ;;  %s1509_s1 = scalar_lea.hbm %s1867_s24, 128 }
  0x86   : > { %p1510_p1 = scmp.ne.s32.totalorder %s1867_s24, %s1509_s1  ;;  %p1511_p3 = pneg %p1869_p9 }
  0x87   : > { %s1514_s20 = scalar_lea.hbm %s2059_s0, 256  ;;  %p1515_p10 = scmp.lt.u32.totalorder %s1867_s24, %s2059_s0 }
  0x88   : > { %p1512_p8 = pnand %p1511_p3, %p1510_p1  ;;  %p1516_p11 = scmp.lt.u32.totalorder %s1514_s20, %s1509_s1 }
  0x89   : > { %p1518_p13 = scmp.lt.u32.totalorder %s1509_s1, %s1867_s24 }
  0x8a   : > { %p1513_p4 = pneg %p1512_p8  ;;  %p1517_p12 = por %p1516_p11, %p1515_p10 }
  0x8c   : > { %p1519_p2 = por %p1518_p13, %p1517_p12 }
  0x8e   : > { %p1520_p5 = pnand %p1519_p2, %p1513_p4 }
  0x90   : > { %1523 = shalt.err (!%p1520_p5)
}
  0x91   : > { %s1524_s17 = scalar_lea.vmem %s1873_s25, 128  ;;  %s1626_s16 = smov [#allocation2]  }
  0x92   : > { %p1525_p1 = scmp.ne.s32.totalorder %s1873_s25, %s1524_s17  ;;  %s1529_s18 = sshll.u32 %s1626_s16, 4  ;;  %s1530_s18 = int_to_ptr.vmem [resolvable:$false] %s1529_s18 }
  0x93   : > { %s1531_s21 = scalar_lea.vmem %s1530_s18, 256  ;;  %p1532_p6 = scmp.lt.s32.totalorder %s1873_s25, %s1530_s18 }
  0x94   : > { %p1527_p8 = pnand %p1525_p1, %p1511_p3  ;;  %p1533_p10 = scmp.lt.s32.totalorder %s1531_s21, %s1524_s17 }
  0x96   : > { %p1528_p7 = pneg %p1527_p8  ;;  %p1534_p11 = por %p1533_p10, %p1532_p6 }
  0x98   : > { %p1535_p12 = pnand %p1534_p11, %p1528_p7 }
  0x9a   : > { %1538 = shalt.err (!%p1535_p12)
}
  0x9b   : > { %s2085_s1 = smov 4   ;;  %p2086_p3 = scmp.ne.s32.totalorder %s2075_s12, 0 }
  0x9c   : > { %1273 = dma.hbm_to_vmem [thread:$0]  (!%p1869_p9), %s1867_s24, 128, %s1873_s25, %s1875_s13, %s2079_s9, %s2079_s9, %s2085_s1  }
  0x9d   : > { %334 = sbr.rel (%p2086_p3) target bundleno = 1890 (0x762), region = 52  ;;  %s1909_s20 = sand.u32 (!%p2086_p3), 1, %s1609_s28  }
  0x9e   : > { %s1092_s15 = sshll.u32 (!%p2086_p3), %s1909_s20, 3  ;;  %s337_s17 = scalar_lea.sflag (!%p2086_p3), [#allocation3], %s1909_s20 }
  0x9f   : > { %s1913_s16 = scalar_lea.vmem (!%p2086_p3), [#allocation2], %s1092_s15 }
  0xa4   : > { %1584 = dma.done.wait (%p1849_p0), %s337_s17, 128  }
  0xa5   : > { %1586 = vsyncadd (%p1849_p0), %s337_s17, 4294967168  ;;  %p2087_p6 = scmp.eq.s32.totalorder %s1698_s11, 0 }
  0xa7   : > { %1588 = dma.done.wait (%p2087_p6), [#allocation7], 1152   ;;  %p2088_p7 = pmov %p2087_p6 }
  0xa8   : > { %p2089_p9 = pmov %p2087_p6 }
  0xa9   : > { %1590 = vsyncadd (%p2088_p7), [#allocation7], 4294966144 }
  0xaa   : > { %1592 = dma.done.wait (%p2089_p9), [#allocation10], 2048   ;;  %p2090_p4 = pmov %p2087_p6 }
  0xac   : > { %1594 = vsyncadd (%p2090_p4), [#allocation10], 4294965248  ;;  %p2091_p13 = pmov %p2090_p4 }
  0xad   : > { %p2092_p2 = pmov %p2090_p4 }
  0xae   : > { %1596 = dma.done.wait (%p2091_p13), [#allocation5], 16  }
  0xaf   : > { %1598 = vsyncadd (%p2092_p2), [#allocation5], 4294967280 }
  0xb0   : > { %365 = sfence }
  0xb1   : > { %v1333_v0 = vld [vmem:[#allocation6] sm:$0xff]   ;;  %v1627_v1 = vmov 0.0   ;;  %v1334_v2 = vld [vmem:[#allocation6 + $0x8] sm:$0xff]   ;;  %vm1628_vm0 = vmmov 0   ;;  %v1335_v3 = vld [vmem:[#allocation6 + $0x10] sm:$0xff]   ;;  %v525_v17 = vlaneseq  ;;  %s1099_s12 = sld [smem:[#allocation12 + $0x1]] }
  0xb2   : > { %1170 = vmatprep.subr.bf16.mxu0 %v1627_v1  ;;  %1190 = vmatprep.subr.bf16.mxu1 %v1627_v1  ;;  %v1336_v4 = vld [vmem:[#allocation6 + $0x18] sm:$0xff]   ;;  %v1337_v5 = vld [vmem:[#allocation6 + $0x20] sm:$0xff]   ;;  %v1338_v6 = vld [vmem:[#allocation6 + $0x28] sm:$0xff]   ;;  %s397_s13 = sld [smem:[#allocation12]]  ;;  %s1142_s9 = sshll.u32 %s1698_s11, 8 }
  0xb3   : > { %1171 = vmatpush3.bf16.msra.mxu0 %v1333_v0  ;;  %1186 = vmatprep.mubr.msk.bf16.mxu0 %vm1628_vm0, %v1627_v1  ;;  %v1339_v7 = vld [vmem:[#allocation6 + $0x30] sm:$0xff]   ;;  %v1340_v8 = vld [vmem:[#allocation6 + $0x38] sm:$0xff]   ;;  %v1100_v10 = vld [vmem:[#allocation8] ss:$0 sm:$0xff]  ;;  %v1948_v18 = vand.u32 127, %v525_v17  ;;  %s2013_s18 = scalar_lea.hbm %s2067_s8, %s1142_s9  ;;  %s944_s11 = scalar_lea.sflag [#allocation4], %s1909_s20 }
  0xb4   : > { %1172 = vmatprep.subr.bf16.mxu0 %v1627_v1  ;;  %1206 = vmatprep.mubr.msk.bf16.mxu1 %vm1628_vm0, %v1627_v1  ;;  %v1341_v9 = vld [vmem:[%s1913_s16] sm:$0xff]   ;;  %v1342_v30 = vld [vmem:[#allocation9] sm:$0xff]   ;;  %v1345_v33 = vld [vmem:[#allocation9 + $0x18] sm:$0xff]   ;;  %p2093_p5 = scmp.ne.s32.totalorder %s2082_s22, 0  ;;  %s1629_s1 = smov [#allocation13]  }
  0xb5   : > { %vm527_vm1 = vcmp.lt.s32.totalorder %v1948_v18, 32  ;;  %1191 = vmatpush3.bf16.msra.mxu1 %v1342_v30  ;;  %v1343_v31 = vld [vmem:[#allocation9 + $0x8] sm:$0xff]   ;;  %v1344_v32 = vld [vmem:[#allocation9 + $0x10] sm:$0xff]   ;;  %v1346_v34 = vld [vmem:[#allocation9 + $0x20] sm:$0xff]   ;;  %s1543_s15 = sshll.u32 %s1629_s1, 4  ;;  %s1544_s15 = int_to_ptr.vmem [resolvable:$false] %s1543_s15 }
  0xb6   : > { %v1952_v21 = vsel %vm527_vm1, 1.0, %v1627_v1  ;;  %1192 = vmatprep.subr.bf16.mxu1 %v1627_v1  ;;  %v1347_v35 = vld [vmem:[#allocation9 + $0x28] sm:$0xff]   ;;  %v1348_v36 = vld [vmem:[#allocation9 + $0x30] sm:$0xff]   ;;  %v1349_v37 = vld [vmem:[#allocation9 + $0x38] sm:$0xff]   ;;  %s1545_s17 = scalar_lea.vmem %s1544_s15, 512 }
  0xb7   : > { %1173 = vmatpush3.bf16.msra.mxu0 %v1334_v2  ;;  %v1111_v45 = vld [vmem:[#allocation8 + $0x1] ss:$0 sm:$0xff]  ;;  %v1112_v47 = vld [vmem:[#allocation8 + $0x2] ss:$0 sm:$0xff]  ;;  %v1963_v50 = vstv %s1099_s12 }
  0xb8   : > { %1174 = vmatprep.subr.bf16.mxu0 %v1627_v1  ;;  %v1967_v59 = vstv %s397_s13  ;;  %s1098_s13 = sshll.u32 %s1909_s20, 4 }
  0xb9   : > { %1193 = vmatpush3.bf16.msra.mxu1 %v1343_v31  ;;  %v1350_v31 = vld [vmem:[#allocation11] sm:$0xff]   ;;  %s393_s14 = scalar_lea.vmem [#allocation13], %s1098_s13 }
  0xba   : > { %1194 = vmatprep.subr.bf16.mxu1 %v1627_v1  ;;  %s957_s24 = sshll.u32 %s393_s14, 4  ;;  %s2015_s24 = int_to_ptr.vmem [resolvable:$true] %s957_s24 }
  0xbb   : > { %1175 = vmatpush3.bf16.msra.mxu0 %v1335_v3  ;;  %s1539_s21 = scalar_lea.vmem %s2015_s24, 256  ;;  %p1546_p10 = scmp.lt.s32.totalorder %s2015_s24, %s1544_s15 }
  0xbc   : > { %1176 = vmatprep.subr.bf16.mxu0 %v1627_v1  ;;  %p1540_p0 = scmp.ne.s32.totalorder %s2015_s24, %s1539_s21  ;;  %p1547_p11 = scmp.lt.s32.totalorder %s1545_s17, %s1539_s21 }
  0xbd   : > { %1195 = vmatpush3.bf16.msra.mxu1 %v1344_v32  ;;  %v1351_v32 = vld [vmem:[#allocation11 + $0x8] sm:$0xff]  }
  0xbe   : > { %1196 = vmatprep.subr.bf16.mxu1 %v1627_v1  ;;  %p1541_p1 = pnand %p1540_p0, %p2093_p5  ;;  %p1548_p12 = por %p1547_p11, %p1546_p10 }
  0xbf   : > { %1177 = vmatpush3.bf16.msra.mxu0 %v1336_v4 }
  0xc0   : > { %1178 = vmatprep.subr.bf16.mxu0 %v1627_v1  ;;  %p1542_p8 = pneg %p1541_p1 }
  0xc1   : > { %1197 = vmatpush3.bf16.msra.mxu1 %v1345_v33  ;;  %v1352_v33 = vld [vmem:[#allocation11 + $0x10] sm:$0xff]  }
  0xc2   : > { %1198 = vmatprep.subr.bf16.mxu1 %v1627_v1  ;;  %p1549_p3 = pnand %p1548_p12, %p1542_p8 }
  0xc3   : > { %1179 = vmatpush3.bf16.msra.mxu0 %v1337_v5 }
  0xc4   : > { %1180 = vmatprep.subr.bf16.mxu0 %v1627_v1 }
  0xc5   : > { %1199 = vmatpush3.bf16.msra.mxu1 %v1346_v34  ;;  %v1353_v34 = vld [vmem:[#allocation11 + $0x18] sm:$0xff]  }
  0xc6   : > { %1200 = vmatprep.subr.bf16.mxu1 %v1627_v1 }
  0xc7   : > { %1181 = vmatpush3.bf16.msra.mxu0 %v1338_v6 }
  0xc8   : > { %1182 = vmatprep.subr.bf16.mxu0 %v1627_v1 }
  0xc9   : > { %1201 = vmatpush3.bf16.msra.mxu1 %v1347_v35  ;;  %v1354_v35 = vld [vmem:[#allocation11 + $0x20] sm:$0xff]  }
  0xca   : > { %1202 = vmatprep.subr.bf16.mxu1 %v1627_v1 }
  0xcb   : > { %1183 = vmatpush3.bf16.msra.mxu0 %v1339_v7 }
  0xcc   : > { %1184 = vmatprep.subr.bf16.mxu0 %v1627_v1 }
  0xcd   : > { %1203 = vmatpush3.bf16.msra.mxu1 %v1348_v36  ;;  %v1356_v36 = vld [vmem:[#allocation11 + $0x30] sm:$0xff]  }
  0xce   : > { %1204 = vmatprep.subr.bf16.mxu1 %v1627_v1 }
  0xcf   : > { %1185 = vmatpush3.bf16.msra.mxu0 %v1340_v8 }
  0xd0   : > { %1210 = vmatprep.subr.bf16.mxu0 %v1627_v1 }
  0xd1   : > { %1205 = vmatpush3.bf16.msra.mxu1 %v1349_v37  ;;  %v1357_v37 = vld [vmem:[#allocation11 + $0x38] sm:$0xff]  }
  0xd2   : > { %1187 = vmatmul.mubr.bf16.vlgmr.msra.gmra.mrb[0].mxu0 %v1341_v9 }
  0xd3   : > { %1226 = vmatprep.mubr.msk.bf16.mxu0 %vm1628_vm0, %v1627_v1  ;;  %1211 = vmatpush3.bf16.msra.mxu0 %v1350_v31 }
  0xd4   : > { %1212 = vmatprep.subr.bf16.mxu0 %v1627_v1 }
  0xd7   : > { %1213 = vmatpush3.bf16.msra.mxu0 %v1351_v32 }
  0xd8   : > { %1214 = vmatprep.subr.bf16.mxu0 %v1627_v1 }
  0xdb   : > { %1215 = vmatpush3.bf16.msra.mxu0 %v1352_v33 }
  0xdc   : > { %1216 = vmatprep.subr.bf16.mxu0 %v1627_v1 }
  0xdf   : > { %1217 = vmatpush3.bf16.msra.mxu0 %v1353_v34 }
  0xe0   : > { %1218 = vmatprep.subr.bf16.mxu0 %v1627_v1 }
  0xe3   : > { %1219 = vmatpush3.bf16.msra.mxu0 %v1354_v35 }
  0xe4   : > { %1220 = vmatprep.subr.bf16.mxu0 %v1627_v1 }
 0x1a5   : > { %v510_v11 = vpop.f32.mrb[0].mxu0 }
 0x1a6   : > { %v511_v12 = vadd.f32 %v1100_v10, %v510_v11  ;;  %v1188_v13 = vpop.f32.mrb[1].mxu0 }
 0x1a7   : > { %v513_v14 = vpop.f32.mrb[2].mxu0 }
 0x1a8   : > { %517 = vadd.xlane.f32.xlu0 %v511_v12  ;;  %v1189_v15 = vpop.f32.mrb[3].mxu0  ;;  %v514_v16 = vadd.f32 %v1100_v10, %v513_v14 }
 0x1ac   : > { %519 = vadd.xlane.f32.xlu0 %v514_v16 }
 0x235   : > { %v518_v19 = vpop.xlane.xlu0 %517 }
 0x236   : > { %v521_v20 = vmul.f32 0.03125, %v518_v19 }
 0x238   : > { %v523_v22 = vsub.f32 %v511_v12, %v521_v20  ;;  %v1113_v12 = vld [vmem:[%s2063_s4] ss:$0 sm:$0xff] }
 0x239   : > { %v520_v23 = vpop.xlane.xlu0 %519 }
 0x23a   : > { %v522_v24 = vmul.f32 0.03125, %v520_v23  ;;  %v530_v25 = vmul.f32 %v1952_v21, %v523_v22 }
 0x23c   : > { %v524_v26 = vsub.f32 %v514_v16, %v522_v24  ;;  %v532_v27 = vmul.f32 %v530_v25, %v530_v25 }
 0x23e   : > { %534 = vadd.xlane.f32.xlu1 %v532_v27  ;;  %v531_v28 = vmul.f32 %v1952_v21, %v524_v26 }
 0x240   : > { %v533_v29 = vmul.f32 %v531_v28, %v531_v28 }
 0x242   : > { %536 = vadd.xlane.f32.xlu1 %v533_v29 }
 0x2cb   : > { %v535_v38 = vpop.xlane.xlu1 %534 }
 0x2cc   : > { %v538_v39 = vmul.f32 0.03125, %v535_v38 }
 0x2ce   : > { %v540_v40 = vadd.f32 1e-05, %v538_v39 }
 0x2cf   : > { %v537_v41 = vpop.xlane.xlu1 %536 }
 0x2d0   : > { %1358 = vrsqrt.f32 %v540_v40  ;;  %v539_v42 = vmul.f32 0.03125, %v537_v41 }
 0x2d2   : > { %v541_v43 = vadd.f32 1e-05, %v539_v42 }
 0x2d4   : > { %1360 = vrsqrt.f32 %v541_v43 }
 0x2da   : > { %v1359_v44 = vpop.eup %1358 }
 0x2db   : > { %v544_v46 = vmul.f32 %v1359_v44, %v530_v25 }
 0x2dd   : > { %v551_v48 = vmul.f32 %v1111_v45, %v544_v46 }
 0x2de   : > { %v1361_v49 = vpop.eup %1360 }
 0x2df   : > { %v545_v51 = vmul.f32 %v1361_v49, %v531_v28  ;;  %v558_v52 = vadd.f32 %v1112_v47, %v551_v48  ;;  %v1123_v48 = vld [vmem:[%s2063_s4 + $0x2] ss:$0 sm:$0xff] }
 0x2e1   : > { %v552_v53 = vmul.f32 %v1111_v45, %v545_v51  ;;  %v566_v54 = vmul.f32 %v1963_v50, %v558_v52  ;;  %v563_v60 = vmul.f32 %v1967_v59, %v558_v52  ;;  %vm560_vm2 = vcmp.ge.f32.partialorder %v558_v52, 0.0  ;;  %v1122_v45 = vld [vmem:[%s2063_s4 + $0x1] ss:$0 sm:$0xff] }
 0x2e3   : > { %v559_v55 = vadd.f32 %v1112_v47, %v552_v53  ;;  %v568_v56 = vmul.f32 1.442695, %v566_v54 }
 0x2e5   : > { %v567_v57 = vmul.f32 %v1963_v50, %v559_v55  ;;  %1362 = vpow2.f32 %v568_v56  ;;  %v564_v63 = vmul.f32 %v1967_v59, %v559_v55  ;;  %vm561_vm4 = vcmp.ge.f32.partialorder %v559_v55, 0.0 }
 0x2e7   : > { %v570_v58 = vmul.f32 1.442695, %v567_v57 }
 0x2e9   : > { %1364 = vpow2.f32 %v570_v58 }
 0x2ef   : > { %v1363_v61 = vpop.eup %1362 }
 0x2f0   : > { %v572_v62 = vmul.f32 %v1363_v61, %v563_v60 }
 0x2f2   : > { %v574_v0 = vsel %vm560_vm2, %v558_v52, %v572_v62  ;;  %vm882_vm2 = vcmp.lt.s32.totalorder %v1948_v18, 8 }
 0x2f3   : > { %v1365_v2 = vpop.eup %1364  ;;  %vm576_vm3 = vcmp.ne.f32.partialorder %v574_v0, %v574_v0 }
 0x2f4   : > { %v573_v3 = vmul.f32 %v1365_v2, %v564_v63  ;;  %v578_v4 = vsel %vm576_vm3, 0.0, %v574_v0 }
 0x2f5   : > { %vm580_vm5 = vcmp.eq.f32.partialorder %v578_v4, inf }
 0x2f6   : > { %v575_v5 = vsel %vm561_vm4, %v559_v55, %v573_v3  ;;  %v582_v6 = vsel %vm580_vm5, 3.4028235e+38, %v578_v4 }
 0x2f7   : > { %vm577_vm6 = vcmp.ne.f32.partialorder %v575_v5, %v575_v5  ;;  %vm584_vm8 = vcmp.eq.f32.partialorder %v582_v6, -inf }
 0x2f8   : > { %v579_v7 = vsel %vm577_vm6, 0.0, %v575_v5  ;;  %v586_v9 = vsel %vm584_vm8, -3.4028235e+38, %v582_v6 }
 0x2f9   : > { %vm581_vm7 = vcmp.eq.f32.partialorder %v579_v7, inf }
 0x2fa   : > { %v583_v8 = vsel %vm581_vm7, 3.4028235e+38, %v579_v7 }
 0x2fb   : > { %vm585_vm9 = vcmp.eq.f32.partialorder %v583_v8, -inf }
 0x2fc   : > { %v587_v10 = vsel %vm585_vm9, -3.4028235e+38, %v583_v8 }
 0x2fd   : > { %v588_v11 = vpack.c.bf16 %v587_v10, %v586_v9 }
 0x2ff   : > { %1207 = vmatmul.mubr.bf16.vlgmr.msra.gmra.mrb[0].mxu1 %v588_v11 }
 0x3d2   : > { %v692_v13 = vpop.f32.mrb[0].mxu1 }
 0x3d3   : > { %v693_v14 = vadd.f32 %v1113_v12, %v692_v13  ;;  %v1208_v15 = vpop.f32.mrb[1].mxu1 }
 0x3d4   : > { %v695_v16 = vpop.f32.mrb[2].mxu1 }
 0x3d5   : > { %v696_v17 = vadd.f32 %v1113_v12, %v695_v16  ;;  %699 = vadd.xlane.f32.xlu0 %v693_v14  ;;  %v1209_v19 = vpop.f32.mrb[3].mxu1  ;;  %v1124_v12 = vld [vmem:[%s2065_s6] ss:$0 sm:$0xff] }
 0x3d7   : > { %701 = vadd.xlane.f32.xlu1 %v696_v17 }
 0x462   : > { %v700_v20 = vpop.xlane.xlu0 %699 }
 0x463   : > { %v703_v22 = vmul.f32 0.03125, %v700_v20 }
 0x464   : > { %v702_v23 = vpop.xlane.xlu1 %701 }
 0x465   : > { %v705_v24 = vsub.f32 %v693_v14, %v703_v22  ;;  %v704_v25 = vmul.f32 0.03125, %v702_v23 }
 0x467   : > { %v706_v26 = vsub.f32 %v696_v17, %v704_v25  ;;  %v707_v27 = vmul.f32 %v1952_v21, %v705_v24  ;;  %v1133_v24 = vsel %vm882_vm2, 1.0, %v1627_v1 }
 0x469   : > { %v709_v28 = vmul.f32 %v707_v27, %v707_v27  ;;  %v708_v29 = vmul.f32 %v1952_v21, %v706_v26  ;;  %v1355_v21 = vld [vmem:[#allocation11 + $0x28] sm:$0xff]  }
 0x46a   : > { %1221 = vmatpush3.bf16.msra.mxu0 %v1355_v21 }
 0x46b   : > { %711 = vadd.xlane.f32.xlu0 %v709_v28  ;;  %v710_v30 = vmul.f32 %v708_v29, %v708_v29  ;;  %1222 = vmatprep.subr.bf16.mxu0 %v1627_v1 }
 0x46d   : > { %713 = vadd.xlane.f32.xlu1 %v710_v30 }
 0x46e   : > { %1223 = vmatpush3.bf16.msra.mxu0 %v1356_v36 }
 0x46f   : > { %1224 = vmatprep.subr.bf16.mxu0 %v1627_v1  ;;  %v1134_v1 = vld [vmem:[%s2065_s6 + $0x1] ss:$0 sm:$0xff] }
 0x472   : > { %1225 = vmatpush3.bf16.msra.mxu0 %v1357_v37 }
 0x4f8   : > { %v712_v38 = vpop.xlane.xlu0 %711 }
 0x4f9   : > { %v715_v39 = vmul.f32 0.03125, %v712_v38 }
 0x4fa   : > { %v714_v40 = vpop.xlane.xlu1 %713 }
 0x4fb   : > { %v717_v41 = vadd.f32 1e-05, %v715_v39  ;;  %v716_v42 = vmul.f32 0.03125, %v714_v40  ;;  %v1135_v39 = vld [vmem:[%s2065_s6 + $0x2] ss:$0 sm:$0xff] }
 0x4fd   : > { %1366 = vrsqrt.f32 %v717_v41  ;;  %v718_v43 = vadd.f32 1e-05, %v716_v42 }
 0x4ff   : > { %1368 = vrsqrt.f32 %v718_v43 }
 0x507   : > { %v1367_v44 = vpop.eup %1366 }
 0x508   : > { %v721_v46 = vmul.f32 %v1367_v44, %v707_v27 }
 0x509   : > { %v1369_v47 = vpop.eup %1368 }
 0x50a   : > { %v728_v49 = vmul.f32 %v1122_v45, %v721_v46  ;;  %v722_v51 = vmul.f32 %v1369_v47, %v708_v29 }
 0x50c   : > { %v735_v52 = vadd.f32 %v1123_v48, %v728_v49  ;;  %v729_v53 = vmul.f32 %v1122_v45, %v722_v51 }
 0x50e   : > { %v741_v54 = vmul.f32 %v735_v52, %v1963_v50  ;;  %v736_v55 = vadd.f32 %v1123_v48, %v729_v53  ;;  %v739_v60 = vmul.f32 %v735_v52, %v1967_v59  ;;  %vm737_vm10 = vcmp.ge.f32.partialorder %v735_v52, 0.0 }
 0x510   : > { %v743_v56 = vmul.f32 1.442695, %v741_v54  ;;  %v742_v57 = vmul.f32 %v736_v55, %v1963_v50  ;;  %v740_v62 = vmul.f32 %v736_v55, %v1967_v59  ;;  %vm738_vm11 = vcmp.ge.f32.partialorder %v736_v55, 0.0 }
 0x512   : > { %1370 = vpow2.f32 %v743_v56  ;;  %v745_v58 = vmul.f32 1.442695, %v742_v57 }
 0x514   : > { %1372 = vpow2.f32 %v745_v58 }
 0x51c   : > { %v1371_v61 = vpop.eup %1370 }
 0x51d   : > { %v747_v63 = vmul.f32 %v1371_v61, %v739_v60 }
 0x51e   : > { %v1373_v0 = vpop.eup %1372 }
 0x51f   : > { %v748_v2 = vmul.f32 %v1373_v0, %v740_v62  ;;  %v749_v3 = vsel %vm737_vm10, %v735_v52, %v747_v63 }
 0x520   : > { %vm751_vm12 = vcmp.ne.f32.partialorder %v749_v3, %v749_v3 }
 0x521   : > { %v750_v4 = vsel %vm738_vm11, %v736_v55, %v748_v2  ;;  %v753_v5 = vsel %vm751_vm12, 0.0, %v749_v3 }
 0x522   : > { %vm752_vm13 = vcmp.ne.f32.partialorder %v750_v4, %v750_v4  ;;  %vm755_vm14 = vcmp.eq.f32.partialorder %v753_v5, inf }
 0x523   : > { %v754_v6 = vsel %vm752_vm13, 0.0, %v750_v4  ;;  %v757_v7 = vsel %vm755_vm14, 3.4028235e+38, %v753_v5 }
 0x524   : > { %vm756_vm15 = vcmp.eq.f32.partialorder %v754_v6, inf  ;;  %vm759_vm0 = vcmp.eq.f32.partialorder %v757_v7, -inf }
 0x525   : > { %v758_v8 = vsel %vm756_vm15, 3.4028235e+38, %v754_v6  ;;  %v761_v9 = vsel %vm759_vm0, -3.4028235e+38, %v757_v7 }
 0x526   : > { %vm760_vm1 = vcmp.eq.f32.partialorder %v758_v8, -inf }
 0x527   : > { %v762_v10 = vsel %vm760_vm1, -3.4028235e+38, %v758_v8 }
 0x528   : > { %v763_v11 = vpack.c.bf16 %v762_v10, %v761_v9 }
 0x52a   : > { %1227 = vmatmul.mubr.bf16.vlgmr.msra.gmra.mrb[4].mxu0 %v763_v11 }
 0x5fd   : > { %v867_v13 = vpop.f32.mrb[4].mxu0 }
 0x5fe   : > { %v868_v14 = vadd.f32 %v1124_v12, %v867_v13  ;;  %v1228_v15 = vpop.f32.mrb[5].mxu0 }
 0x5ff   : > { %v870_v16 = vpop.f32.mrb[6].mxu0 }
 0x600   : > { %v871_v17 = vadd.f32 %v1124_v12, %v870_v16  ;;  %874 = vadd.xlane.f32.xlu0 %v868_v14  ;;  %v1229_v19 = vpop.f32.mrb[7].mxu0 }
 0x602   : > { %876 = vadd.xlane.f32.xlu1 %v871_v17 }
 0x68d   : > { %v875_v20 = vpop.xlane.xlu0 %874 }
 0x68e   : > { %v878_v22 = vmul.f32 0.125, %v875_v20 }
 0x68f   : > { %v877_v23 = vpop.xlane.xlu1 %876 }
 0x690   : > { %v880_v25 = vsub.f32 %v868_v14, %v878_v22  ;;  %v879_v26 = vmul.f32 0.125, %v877_v23 }
 0x692   : > { %v881_v27 = vsub.f32 %v871_v17, %v879_v26  ;;  %v885_v28 = vmul.f32 %v1133_v24, %v880_v25 }
 0x694   : > { %v887_v29 = vmul.f32 %v885_v28, %v885_v28  ;;  %v886_v30 = vmul.f32 %v1133_v24, %v881_v27 }
 0x696   : > { %889 = vadd.xlane.f32.xlu0 %v887_v29  ;;  %v888_v31 = vmul.f32 %v886_v30, %v886_v30 }
 0x698   : > { %891 = vadd.xlane.f32.xlu1 %v888_v31 }
 0x723   : > { %v890_v32 = vpop.xlane.xlu0 %889 }
 0x724   : > { %v893_v33 = vmul.f32 0.125, %v890_v32 }
 0x725   : > { %v892_v34 = vpop.xlane.xlu1 %891 }
 0x726   : > { %v895_v35 = vadd.f32 1e-05, %v893_v33  ;;  %v894_v21 = vmul.f32 0.125, %v892_v34 }
 0x728   : > { %1374 = vrsqrt.f32 %v895_v35  ;;  %v896_v18 = vadd.f32 1e-05, %v894_v21 }
 0x72a   : > { %1376 = vrsqrt.f32 %v896_v18 }
 0x732   : > { %v1375_v36 = vpop.eup %1374 }
 0x733   : > { %v899_v37 = vmul.f32 %v1375_v36, %v885_v28 }
 0x734   : > { %v1377_v38 = vpop.eup %1376 }
 0x735   : > { %v906_v40 = vmul.f32 %v1134_v1, %v899_v37  ;;  %v900_v41 = vmul.f32 %v1377_v38, %v886_v30 }
 0x737   : > { %v913_v42 = vadd.f32 %v1135_v39, %v906_v40  ;;  %v907_v43 = vmul.f32 %v1134_v1, %v900_v41 }
 0x739   : > { %v919_v44 = vmul.f32 %v913_v42, %v1963_v50  ;;  %v914_v45 = vadd.f32 %v1135_v39, %v907_v43  ;;  %v917_v49 = vmul.f32 %v913_v42, %v1967_v59  ;;  %vm915_vm3 = vcmp.ge.f32.partialorder %v913_v42, 0.0 }
 0x73b   : > { %v921_v46 = vmul.f32 1.442695, %v919_v44  ;;  %v920_v47 = vmul.f32 %v914_v45, %v1963_v50  ;;  %v918_v52 = vmul.f32 %v914_v45, %v1967_v59  ;;  %vm916_vm4 = vcmp.ge.f32.partialorder %v914_v45, 0.0 }
 0x73d   : > { %1378 = vpow2.f32 %v921_v46  ;;  %v923_v48 = vmul.f32 1.442695, %v920_v47 }
 0x73f   : > { %1380 = vpow2.f32 %v923_v48 }
 0x747   : > { %v1379_v51 = vpop.eup %1378 }
 0x748   : > { %v925_v53 = vmul.f32 %v1379_v51, %v917_v49 }
 0x749   : > { %v1381_v54 = vpop.eup %1380 }
 0x74a   : > { %v926_v55 = vmul.f32 %v1381_v54, %v918_v52  ;;  %v927_v56 = vsel %vm915_vm3, %v913_v42, %v925_v53 }
 0x74b   : > { %vm929_vm5 = vcmp.ne.f32.partialorder %v927_v56, %v927_v56 }
 0x74c   : > { %v928_v57 = vsel %vm916_vm4, %v914_v45, %v926_v55  ;;  %v931_v58 = vsel %vm929_vm5, 0.0, %v927_v56 }
 0x74d   : > { %vm930_vm6 = vcmp.ne.f32.partialorder %v928_v57, %v928_v57  ;;  %vm933_vm7 = vcmp.eq.f32.partialorder %v931_v58, inf }
 0x74e   : > { %v932_v50 = vsel %vm930_vm6, 0.0, %v928_v57  ;;  %v935_v60 = vsel %vm933_vm7, 3.4028235e+38, %v931_v58 }
 0x74f   : > { %vm934_vm8 = vcmp.eq.f32.partialorder %v932_v50, inf  ;;  %vm937_vm9 = vcmp.eq.f32.partialorder %v935_v60, -inf }
 0x750   : > { %v936_v59 = vsel %vm934_vm8, 3.4028235e+38, %v932_v50  ;;  %v939_v61 = vsel %vm937_vm9, -3.4028235e+38, %v935_v60 }
 0x751   : > { %vm938_vm10 = vcmp.eq.f32.partialorder %v936_v59, -inf  ;;  %941 = vst [vmem:[%s393_s14] sm:$0xff] %v939_v61 }
 0x752   : > { %v940_v62 = vsel %vm938_vm10, -3.4028235e+38, %v936_v59 }
 0x753   : > { %942 = vst [vmem:[%s393_s14 + $0x8] sm:$0xff] %v940_v62 }
 0x754   : > { %1552 = shalt.err (!%p1549_p3)
}
 0x755   : > { %s1553_s16 = scalar_lea.hbm %s2013_s18, 256  ;;  %s1557_s9 = scalar_lea.hbm %s2067_s8, 512 }
 0x756   : > { %p1554_p6 = scmp.ne.s32.totalorder %s2013_s18, %s1553_s16  ;;  %p1558_p4 = scmp.lt.u32.totalorder %s2013_s18, %s2067_s8 }
 0x757   : > { %p1559_p13 = scmp.lt.u32.totalorder %s1557_s9, %s1553_s16  ;;  %p1561_p0 = scmp.lt.u32.totalorder %s1553_s16, %s2013_s18 }
 0x758   : > { %p1555_p7 = pnand %p1554_p6, %p2093_p5 }
 0x759   : > { %p1560_p2 = por %p1559_p13, %p1558_p4 }
 0x75a   : > { %p1556_p9 = pneg %p1555_p7 }
 0x75b   : > { %p1562_p1 = por %p1561_p0, %p1560_p2 }
 0x75d   : > { %p1563_p8 = pnand %p1562_p1, %p1556_p9 }
 0x75f   : > { %1566 = shalt.err (!%p1563_p8)
}
 0x760   : > { %s1630_s23 = smov 128   ;;  %s1631_s21 = smov 8  }
 0x761   : > { %1252 = dma.vmem_to_hbm [thread:$0]  (%p2093_p5), %s2015_s24, 256, %s2013_s18, %s944_s11, %s1630_s23, %s1630_s23, %s1631_s21  }
 0x762 PF: > { %s972_s1 = sand.u32 1, %s1605_s27   ;;  %p2094_p10 = scmp.ne.s32.totalorder %s2083_s10, 0 }
 0x763   : > { %p2095_p11 = scmp.ge.s32.totalorder %s1617_s30, 2  ;;  %s973_s15 = scalar_lea.sflag [#allocation4], %s972_s1 }
 0x765   : > { %p1275_p12 = pnand %p2095_p11, %p2094_p10 }
 0x767   : > { %1600 = dma.done.wait (!%p1275_p12), %s973_s15, 256  }
 0x768   : > { %1602 = vsyncadd (!%p1275_p12), %s973_s15, 4294967040  ;;  %p24_p3 = scmp.ge.s32.totalorder %s1833_s19, 4   ;;  %s2096_s27 = smov %s1609_s28 }
 0x769   : > { %s2097_s28 = smov %s1613_s29  ;;  %s2098_s29 = smov %s1845_s26 }
 0x76a   : > { %s2099_s30 = smov %s1833_s19  ;;  %26 = sbr.rel (!%p24_p3) target bundleno = 10 (0xa), region = 118 }
 0x771   :  { %978 = vsyncpa [#allocation3], 1 }
 0x772   :  { %980 = vsyncpa [#allocation3 + $0x1], 1 }
 0x773   :  { %981 = vsyncpa [#allocation7], 1 }
 0x774   :  { %982 = vsyncpa [#allocation10], 1 }
 0x775   :  { %983 = vsyncpa [#allocation4], 1 }
 0x776   :  { %985 = vsyncpa [#allocation4 + $0x1], 1 }
 0x777   :  { %986 = vsyncpa [#allocation5], 1 }
 0x778   :  { %988 = vsyncpa [#allocation5 + $0x1], 1 }

</bundles_post_ra>
